<compile_context>
chip_gen: v5e
topology: v5e:2x2
jax: 0.10.0
libtpu: 0.0.40
codegen_flags: <defaults>
</compile_context>

<pallas_src>
import functools

import jax
import jax.numpy as jnp
from jax.experimental import pallas as pl
from jax.experimental.pallas import tpu as pltpu


# ---------------------------------------------------------------------------
# In-kernel helpers
# ---------------------------------------------------------------------------
def _conv_mask_flat(avg, mx, w_ref, b_ref, *, H, W, K):
    """sigmoid(bias + KxK 'same' zero-padded cross-correlation of [avg | mx]).

    avg, mx: (..., H*W) f32 pooled maps in flattened row-major (y*W + x)
    layout.  A tap at (dy, dx) is a lane roll by dy*W + dx; iota-derived
    row/col boundary masks (f32 multiplies) reproduce the zero padding.
    The dj sum is factored so only K extra lane rolls are needed.
    """
    HW = H * W
    p = (K - 1) // 2
    shp = avg.shape
    ax = len(shp) - 1

    pos = None
    cols = None
    if K > 1:
        pos = jax.lax.broadcasted_iota(jnp.int32, shp, ax)
        # column index without integer division: pow-2 W -> bitwise and.
        cols = (pos & (W - 1)) if (W & (W - 1)) == 0 else (pos % W)

    # pre[dj][g] = sum_{ci,di} w[ci,di,dj] * m_ci[g + dy*W] * row_ok(g)
    pre = [None] * K
    for ci, m in enumerate((avg, mx)):
        for di in range(K):
            dy = di - p
            if dy == 0:
                r = m
            else:
                # row_ok(g): row(g) + dy in [0, H)  <=>  pos in [(-dy)*W, (H-dy)*W)
                rok = jnp.logical_and(pos >= (-dy) * W,
                                      pos < (H - dy) * W).astype(jnp.float32)
                r = pltpu.roll(m, (-dy * W) % HW, ax) * rok
            for dj in range(K):
                t = w_ref[ci * K * K + di * K + dj] * r
                pre[dj] = t if pre[dj] is None else pre[dj] + t

    acc = jnp.zeros(shp, jnp.float32) + b_ref[0]
    for dj in range(K):
        dx = dj - p
        if dx == 0:
            acc = acc + pre[dj]
        else:
            cok = jnp.logical_and(cols >= -dx, cols < W - dx).astype(jnp.float32)
            acc = acc + cok * pltpu.roll(pre[dj], (-dx) % HW, ax)
    return jax.nn.sigmoid(acc)


def _fused_kernel(x_ref, w_ref, b_ref, o_ref, *, C, H, W, K, c_chunk):
    """One (nb, C, HW) slab per grid step: pool over channels, conv, scale."""
    nb = x_ref.shape[0]
    HW = H * W

    # Channel-chunked f32 accumulation (avoids a full-slab f32 temp for
    # sub-f32 inputs); max is exact in the native dtype.
    csum = jnp.zeros((nb, HW), jnp.float32)
    cmax = jnp.full((nb, HW), -jnp.inf, jnp.float32)
    for c0 in range(0, C, c_chunk):
        cc = min(c_chunk, C - c0)
        blk = x_ref[:, c0:c0 + cc, :]                       # (nb, cc, HW)
        csum = csum + jnp.sum(blk.astype(jnp.float32), axis=1)
        cmax = jnp.maximum(cmax, jnp.max(blk, axis=1).astype(jnp.float32))

    avg = csum * (1.0 / C)                                  # true channel mean
    mask = _conv_mask_flat(avg, cmax, w_ref, b_ref, H=H, W=W, K=K)  # (nb, HW)

    # Dtype-preserving scale: mask cast once, lane-dense (nb, C, HW) store.
    o_ref[...] = x_ref[...] * mask[:, None, :].astype(o_ref.dtype)


def _mask_kernel(x_ref, w_ref, b_ref, m_ref, sum_sc, max_sc, *, C, H, W, K):
    """Fallback pass 1: reduce channel blocks, emit the (1, HW) mask."""
    ci = pl.program_id(1)
    tc = x_ref.shape[0]

    @pl.when(ci == 0)
    def _init():
        sum_sc[...] = jnp.zeros_like(sum_sc)
        max_sc[...] = jnp.full_like(max_sc, -jnp.inf)

    x = x_ref[...]                                          # (tc, HW), native dtype
    rem = C % tc                                            # static
    if rem:
        # cdiv grid: mask the ragged channels of the last block.
        ch = jax.lax.broadcasted_iota(jnp.int32, x.shape, 0)
        limit = jnp.where(ci == pl.num_programs(1) - 1, rem, tc)
        valid = ch < limit
        xs = jnp.where(valid, x, jnp.zeros((), x.dtype))
        xm = jnp.where(valid, x, jnp.full((), -jnp.inf, x.dtype))
    else:
        xs = x
        xm = x

    sum_sc[...] = sum_sc[...] + jnp.sum(xs.astype(jnp.float32), axis=0,
                                        keepdims=True)
    max_sc[...] = jnp.maximum(max_sc[...],
                              jnp.max(xm, axis=0, keepdims=True).astype(jnp.float32))

    @pl.when(ci == pl.num_programs(1) - 1)
    def _finalize():
        avg = sum_sc[...] * (1.0 / C)                       # divide by TRUE C
        m_ref[...] = _conv_mask_flat(avg, max_sc[...], w_ref, b_ref,
                                     H=H, W=W, K=K)


def _scale_kernel(x_ref, m_ref, o_ref):
    """Fallback pass 2: lane-dense (tc, HW) scale, in x's dtype."""
    o_ref[...] = x_ref[...] * m_ref[...].astype(o_ref.dtype)


# ---------------------------------------------------------------------------
# Wrapper
# ---------------------------------------------------------------------------
def _vmem_block_bytes(shape, dtype):
    """VMEM footprint of a block: last dim pads to 128 lanes, 2nd-to-last to
    the dtype's sublane tile (8 for f32, 16 for bf16, 32 for int8)."""
    itemsize = jnp.dtype(dtype).itemsize
    dims = [int(d) for d in shape]
    dims[-1] = -(-dims[-1] // 128) * 128
    if len(dims) >= 2:
        sub = max(1, 32 // itemsize)
        dims[-2] = -(-dims[-2] // sub) * sub
    n = itemsize
    for d in dims:
        n *= d
    return n


def _vmem_capacity_bytes():
    """Physical VMEM capacity of the local TPU (conservative fallback)."""
    try:
        info = pltpu.get_tpu_info()
        for attr in ("vmem_capacity_bytes", "vmem_size_bytes", "vmem_bytes"):
            cap = int(getattr(info, attr, 0) or 0)
            if cap > 0:
                return cap
    except Exception:
        pass
    return 64 << 20          # v7x physical size -> safe everywhere


def spatial_attention(x, w, b, *, vmem_budget_bytes=None, max_channel_tile=None):
    """out = x * sigmoid(Conv2d(2, 1, K, pad=same)([mean_c(x) | max_c(x)])).

    x: (B, C, H, W) feature map (f32 or bf16).
    w: (2, K, K) conv weight  == torch Conv2d(2, 1, K).weight[0]  (odd K).
    b: (1,)      conv bias    == torch Conv2d(2, 1, K).bias.
    """
    B, C, H, W = (int(d) for d in x.shape)
    two, K, K2 = (int(d) for d in w.shape)
    assert two == 2 and K == K2 and K % 2 == 1, "weight must be (2, K, K), odd K"
    HW = H * W
    itemsize = jnp.dtype(x.dtype).itemsize
    is_f32 = jnp.dtype(x.dtype) == jnp.dtype(jnp.float32)

    cap = _vmem_capacity_bytes()
    if vmem_budget_bytes is None:
        vmem_budget_bytes = (cap // 4) * 3          # ~96 MiB v5e/v6e, ~48 MiB v7x

    wf = jnp.asarray(w, jnp.float32).reshape(-1)    # (2*K*K,) -> SMEM
    bf = jnp.asarray(b, jnp.float32).reshape(-1)    # (1,)     -> SMEM
    smem_spec = pl.BlockSpec(memory_space=pltpu.MemorySpace.SMEM)

    xf = x.reshape(B, C, HW)                        # contiguous -> free

    # ---------------- fused single-pass path (1 read + 1 write of x) --------
    def fused_need(nb_):
        slab = _vmem_block_bytes((nb_, C, HW), x.dtype)          # in / out block
        pooled = _vmem_block_bytes((nb_, HW), jnp.float32)       # conv/pool temps
        if is_f32:
            cchunk, chunk_b = C, 0
        else:
            cchunk = max(1, -(-C // 8))             # <= 8 unrolled f32 chunks
            chunk_b = 2 * _vmem_block_bytes((nb_, cchunk, HW), jnp.float32)
        need = 4 * slab + (K + 10) * pooled + chunk_b + (4 << 20)
        return need, cchunk

    if fused_need(1)[0] <= vmem_budget_bytes:
        # Pack nb images per step: >= ~4 MiB per step to amortise per-step
        # overhead, but keep >= 2 grid steps so both v7x TCs get work.
        nb = 1
        for d in range(1, B + 1):
            if B % d:
                continue
            if fused_need(d)[0] > vmem_budget_bytes:
                break
            if d > 1 and B >= 2 and B // d < 2:
                break
            nb = d
            if _vmem_block_bytes((d, C, HW), x.dtype) >= (4 << 20):
                break
        need, c_chunk = fused_need(nb)
        # TODO(synk): for B == 1 on v7x, add a second parallel grid axis (or
        # route to the 2-pass path) so both TensorCores stream the slab.
        kernel = functools.partial(_fused_kernel, C=C, H=H, W=W, K=K,
                                   c_chunk=c_chunk)
        out = pl.pallas_call(
            kernel,
            out_shape=jax.ShapeDtypeStruct((B, C, HW), x.dtype),
            grid=(B // nb,),
            in_specs=[
                pl.BlockSpec((nb, C, HW), lambda bi: (bi, 0, 0)),
                smem_spec,      # conv weights (2*K*K,)
                smem_spec,      # conv bias    (1,)
            ],
            out_specs=pl.BlockSpec((nb, C, HW), lambda bi: (bi, 0, 0)),
            compiler_params=pltpu.CompilerParams(
                dimension_semantics=("parallel",),
                vmem_limit_bytes=int(min(cap, max(need, 32 << 20)))),
        )(xf, wf, bf)
        return out.reshape(B, C, H, W)

    # ---------------- channel-tiled two-pass fallback ------------------------
    # Costs one extra HBM read of x but bounds per-step VMEM and gives the
    # grid B * n_cb steps (megacore friendly).  Blocks target 4-8 MiB.
    sub = max(8, 32 // itemsize)                    # sublane tile of x's dtype
    target = max(2 << 20, min(8 << 20, max(vmem_budget_bytes, 16 << 20) // 10))
    per_ch = max(1, _vmem_block_bytes((sub, HW), x.dtype) // sub)
    tc = max(1, target // per_ch)
    if max_channel_tile is not None:
        tc = min(tc, int(max_channel_tile))
    tc = min(tc, C)
    if tc < C:
        tc = min(C, max(sub, (tc // sub) * sub))    # keep block sublane-legal
    if tc < C and C % tc:
        # Prefer a nearby exact divisor of C (avoids ragged-block masking).
        d = (tc // sub) * sub
        while d >= sub and C % d:
            d -= sub
        if d >= sub and 2 * d >= tc:
            tc = d
    n_cb = -(-C // tc)
    # TODO(synk): if even a single (sub, HW) channel slice exceeds the VMEM
    # budget, add spatial tiling with (K-1)//2 halo rows/cols for the conv.

    blk = _vmem_block_bytes((tc, HW), x.dtype)
    blk_f32 = _vmem_block_bytes((tc, HW), jnp.float32)
    pooled = _vmem_block_bytes((1, HW), jnp.float32)
    pass_vmem = int(min(cap, max(32 << 20,
                                 2 * blk + blk_f32 + (K + 12) * pooled + (4 << 20),
                                 4 * blk + 2 * pooled + (4 << 20))))

    # Pass 1: channel-block reduction -> (B, 1, HW) attention mask.
    mask_kernel = functools.partial(_mask_kernel, C=C, H=H, W=W, K=K)
    mask = pl.pallas_call(
        mask_kernel,
        out_shape=jax.ShapeDtypeStruct((B, 1, HW), jnp.float32),
        grid=(B, n_cb),
        in_specs=[
            pl.BlockSpec((pl.Squeezed(), tc, HW), lambda bi, ci: (bi, ci, 0)),
            smem_spec, smem_spec,
        ],
        out_specs=pl.BlockSpec((pl.Squeezed(), 1, HW), lambda bi, ci: (bi, 0, 0)),
        scratch_shapes=[pltpu.VMEM((1, HW), jnp.float32),
                        pltpu.VMEM((1, HW), jnp.float32)],
        compiler_params=pltpu.CompilerParams(
            dimension_semantics=("parallel", "arbitrary"),
            vmem_limit_bytes=pass_vmem),
    )(xf, wf, bf)

    # Pass 2: fully-parallel lane-dense elementwise scale.
    out = pl.pallas_call(
        _scale_kernel,
        out_shape=jax.ShapeDtypeStruct((B, C, HW), x.dtype),
        grid=(B, n_cb),
        in_specs=[
            pl.BlockSpec((pl.Squeezed(), tc, HW), lambda bi, ci: (bi, ci, 0)),
            pl.BlockSpec((pl.Squeezed(), 1, HW), lambda bi, ci: (bi, 0, 0)),
        ],
        out_specs=pl.BlockSpec((pl.Squeezed(), tc, HW),
                               lambda bi, ci: (bi, ci, 0)),
        compiler_params=pltpu.CompilerParams(
            dimension_semantics=("parallel", "parallel"),
            vmem_limit_bytes=pass_vmem),
    )(xf, mask)
    return out.reshape(B, C, H, W)


# ---------------------------------------------------------------------------
# Pure-JAX reference mirroring the PyTorch forward
# ---------------------------------------------------------------------------
def reference(x, w, b):
    B, C, H, W = x.shape
    K = w.shape[-1]
    p = (K - 1) // 2
    avg = jnp.mean(x, axis=1)                           # (B, H, W)
    mx = jnp.max(x, axis=1)                             # (B, H, W)
    m = jnp.stack([avg, mx], axis=1)                    # (B, 2, H, W)
    mp = jnp.pad(m, ((0, 0), (0, 0), (p, p), (p, p)))   # zero 'same' padding
    acc = jnp.zeros((B, H, W), jnp.float32) + b[0]
    for c in range(2):                                  # cross-correlation
        for i in range(K):
            for j in range(K):
                acc = acc + w[c, i, j] * mp[:, c, i:i + H, j:j + W]
    mask = jax.nn.sigmoid(acc)
    return x * mask[:, None, :, :]


if __name__ == "__main__":
    B, C, H, W = 2, 16, 16, 16
    K = 7                                   # CBAM's usual spatial kernel size

    key = jax.random.PRNGKey(0)
    kx, kw, kb = jax.random.split(key, 3)
    x = jax.random.normal(kx, (B, C, H, W), dtype=jnp.float32)
    # Conv2d(2, 1, K).weight has shape (1, 2, K, K) -> pass weight[0]; bias (1,)
    w = jax.random.normal(kw, (2, K, K), dtype=jnp.float32) * 0.5
    b = jax.random.normal(kb, (1,), dtype=jnp.float32) * 0.1

    ref = reference(x, w, b)

    # Path 1: fused single-pass (whole (nb, C, HW) slab fits the VMEM budget).
    out_fused = jax.block_until_ready(spatial_attention(x, w, b))
    assert out_fused.shape == (B, C, H, W)
    assert jnp.allclose(out_fused, ref, atol=1e-5, rtol=1e-5), "fused mismatch"

    # Path 2: force the channel-tiled two-pass fallback (what large slabs use)
    # with two channel blocks, exercising the reduction + scale passes.
    out_tiled = jax.block_until_ready(
        spatial_attention(x, w, b, vmem_budget_bytes=0, max_channel_tile=8))
    assert out_tiled.shape == (B, C, H, W)
    assert jnp.allclose(out_tiled, ref, atol=1e-5, rtol=1e-5), "tiled mismatch"

    print("KERNEL_OK")
</pallas_src>

<mosaic_0001>
module attributes {stable_mosaic.version = 11 : i64} {
  func.func @_fused_kernel(%arg0: i32, %arg1: memref<1x16x256xf32, #tpu.memory_space<vmem>>, %arg2: memref<98xf32, #tpu.memory_space<smem>>, %arg3: memref<1xf32, #tpu.memory_space<smem>>, %arg4: memref<1x16x256xf32, #tpu.memory_space<vmem>>) attributes {dimension_semantics = [#tpu.dimension_semantics<parallel>], iteration_bounds = array<i64: 2>, scalar_prefetch = 0 : i64, scratch_operands = 0 : i64, tpu.core_type = #tpu.core_type<tc>, window_params = [{transform_indices = @transform_0, window_bounds = array<i64: 1, 16, 256>}, {transform_indices = @transform_1, window_bounds = array<i64: 98>}, {transform_indices = @transform_2, window_bounds = array<i64: 1>}, {transform_indices = @transform_3, window_bounds = array<i64: 1, 16, 256>}]} {
    %cst = arith.constant 0.000000e+00 : f32
    %0 = vector.broadcast %cst : f32 to vector<1x256xf32>
    %cst_0 = arith.constant 0xFF800000 : f32
    %1 = vector.broadcast %cst_0 : f32 to vector<1x256xf32>
    %c0 = arith.constant 0 : index
    %c0_1 = arith.constant 0 : index
    %c0_2 = arith.constant 0 : index
    %2 = vector.load %arg1[%c0, %c0_1, %c0_2] : memref<1x16x256xf32, #tpu.memory_space<vmem>>, vector<1x16x256xf32>
    %cst_3 = arith.constant dense<0.000000e+00> : vector<1x256xf32>
    %3 = vector.multi_reduction <add>, %2, %cst_3 [1] : vector<1x16x256xf32> to vector<1x256xf32>
    %4 = arith.addf %0, %3 : vector<1x256xf32>
    %cst_4 = arith.constant dense<0xFF800000> : vector<1x256xf32>
    %5 = vector.multi_reduction <maximumf>, %2, %cst_4 [1] : vector<1x16x256xf32> to vector<1x256xf32>
    %6 = arith.maximumf %1, %5 : vector<1x256xf32>
    %cst_5 = arith.constant 6.250000e-02 : f32
    %7 = vector.broadcast %cst_5 : f32 to vector<1x256xf32>
    %8 = arith.mulf %4, %7 : vector<1x256xf32>
    %9 = tpu.iota {dimensions = array<i32: 1>} : vector<1x256xi32>
    %c15_i32 = arith.constant 15 : i32
    %10 = vector.broadcast %c15_i32 : i32 to vector<1x256xi32>
    %11 = arith.andi %9, %10 : vector<1x256xi32>
    %c48_i32 = arith.constant 48 : i32
    %12 = vector.broadcast %c48_i32 : i32 to vector<1x256xi32>
    %13 = arith.cmpi sge, %9, %12 : vector<1x256xi32>
    %c304_i32 = arith.constant 304 : i32
    %14 = vector.broadcast %c304_i32 : i32 to vector<1x256xi32>
    %15 = arith.cmpi slt, %9, %14 : vector<1x256xi32>
    %16 = arith.andi %13, %15 : vector<1x256xi1>
    %17 = arith.extui %16 : vector<1x256xi1> to vector<1x256xi32>
    %18 = arith.sitofp %17 : vector<1x256xi32> to vector<1x256xf32>
    %c48_i32_6 = arith.constant 48 : i32
    %19 = tpu.dynamic_rotate %8 by %c48_i32_6 dim 1 : vector<1x256xf32>, i32 -> vector<1x256xf32>
    %20 = arith.mulf %19, %18 : vector<1x256xf32>
    %c0_7 = arith.constant 0 : index
    %21 = memref.load %arg2[%c0_7] : memref<98xf32, #tpu.memory_space<smem>>
    %22 = vector.broadcast %21 : f32 to vector<1x256xf32>
    %23 = arith.mulf %22, %20 : vector<1x256xf32>
    %c1 = arith.constant 1 : index
    %24 = memref.load %arg2[%c1] : memref<98xf32, #tpu.memory_space<smem>>
    %25 = vector.broadcast %24 : f32 to vector<1x256xf32>
    %26 = arith.mulf %25, %20 : vector<1x256xf32>
    %c2 = arith.constant 2 : index
    %27 = memref.load %arg2[%c2] : memref<98xf32, #tpu.memory_space<smem>>
    %28 = vector.broadcast %27 : f32 to vector<1x256xf32>
    %29 = arith.mulf %28, %20 : vector<1x256xf32>
    %c3 = arith.constant 3 : index
    %30 = memref.load %arg2[%c3] : memref<98xf32, #tpu.memory_space<smem>>
    %31 = vector.broadcast %30 : f32 to vector<1x256xf32>
    %32 = arith.mulf %31, %20 : vector<1x256xf32>
    %c4 = arith.constant 4 : index
    %33 = memref.load %arg2[%c4] : memref<98xf32, #tpu.memory_space<smem>>
    %34 = vector.broadcast %33 : f32 to vector<1x256xf32>
    %35 = arith.mulf %34, %20 : vector<1x256xf32>
    %c5 = arith.constant 5 : index
    %36 = memref.load %arg2[%c5] : memref<98xf32, #tpu.memory_space<smem>>
    %37 = vector.broadcast %36 : f32 to vector<1x256xf32>
    %38 = arith.mulf %37, %20 : vector<1x256xf32>
    %c6 = arith.constant 6 : index
    %39 = memref.load %arg2[%c6] : memref<98xf32, #tpu.memory_space<smem>>
    %40 = vector.broadcast %39 : f32 to vector<1x256xf32>
    %41 = arith.mulf %40, %20 : vector<1x256xf32>
    %c32_i32 = arith.constant 32 : i32
    %42 = vector.broadcast %c32_i32 : i32 to vector<1x256xi32>
    %43 = arith.cmpi sge, %9, %42 : vector<1x256xi32>
    %c288_i32 = arith.constant 288 : i32
    %44 = vector.broadcast %c288_i32 : i32 to vector<1x256xi32>
    %45 = arith.cmpi slt, %9, %44 : vector<1x256xi32>
    %46 = arith.andi %43, %45 : vector<1x256xi1>
    %47 = arith.extui %46 : vector<1x256xi1> to vector<1x256xi32>
    %48 = arith.sitofp %47 : vector<1x256xi32> to vector<1x256xf32>
    %c32_i32_8 = arith.constant 32 : i32
    %49 = tpu.dynamic_rotate %8 by %c32_i32_8 dim 1 : vector<1x256xf32>, i32 -> vector<1x256xf32>
    %50 = arith.mulf %49, %48 : vector<1x256xf32>
    %c7 = arith.constant 7 : index
    %51 = memref.load %arg2[%c7] : memref<98xf32, #tpu.memory_space<smem>>
    %52 = vector.broadcast %51 : f32 to vector<1x256xf32>
    %53 = arith.mulf %52, %50 : vector<1x256xf32>
    %54 = arith.addf %23, %53 : vector<1x256xf32>
    %c8 = arith.constant 8 : index
    %55 = memref.load %arg2[%c8] : memref<98xf32, #tpu.memory_space<smem>>
    %56 = vector.broadcast %55 : f32 to vector<1x256xf32>
    %57 = arith.mulf %56, %50 : vector<1x256xf32>
    %58 = arith.addf %26, %57 : vector<1x256xf32>
    %c9 = arith.constant 9 : index
    %59 = memref.load %arg2[%c9] : memref<98xf32, #tpu.memory_space<smem>>
    %60 = vector.broadcast %59 : f32 to vector<1x256xf32>
    %61 = arith.mulf %60, %50 : vector<1x256xf32>
    %62 = arith.addf %29, %61 : vector<1x256xf32>
    %c10 = arith.constant 10 : index
    %63 = memref.load %arg2[%c10] : memref<98xf32, #tpu.memory_space<smem>>
    %64 = vector.broadcast %63 : f32 to vector<1x256xf32>
    %65 = arith.mulf %64, %50 : vector<1x256xf32>
    %66 = arith.addf %32, %65 : vector<1x256xf32>
    %c11 = arith.constant 11 : index
    %67 = memref.load %arg2[%c11] : memref<98xf32, #tpu.memory_space<smem>>
    %68 = vector.broadcast %67 : f32 to vector<1x256xf32>
    %69 = arith.mulf %68, %50 : vector<1x256xf32>
    %70 = arith.addf %35, %69 : vector<1x256xf32>
    %c12 = arith.constant 12 : index
    %71 = memref.load %arg2[%c12] : memref<98xf32, #tpu.memory_space<smem>>
    %72 = vector.broadcast %71 : f32 to vector<1x256xf32>
    %73 = arith.mulf %72, %50 : vector<1x256xf32>
    %74 = arith.addf %38, %73 : vector<1x256xf32>
    %c13 = arith.constant 13 : index
    %75 = memref.load %arg2[%c13] : memref<98xf32, #tpu.memory_space<smem>>
    %76 = vector.broadcast %75 : f32 to vector<1x256xf32>
    %77 = arith.mulf %76, %50 : vector<1x256xf32>
    %78 = arith.addf %41, %77 : vector<1x256xf32>
    %c16_i32 = arith.constant 16 : i32
    %79 = vector.broadcast %c16_i32 : i32 to vector<1x256xi32>
    %80 = arith.cmpi sge, %9, %79 : vector<1x256xi32>
    %c272_i32 = arith.constant 272 : i32
    %81 = vector.broadcast %c272_i32 : i32 to vector<1x256xi32>
    %82 = arith.cmpi slt, %9, %81 : vector<1x256xi32>
    %83 = arith.andi %80, %82 : vector<1x256xi1>
    %84 = arith.extui %83 : vector<1x256xi1> to vector<1x256xi32>
    %85 = arith.sitofp %84 : vector<1x256xi32> to vector<1x256xf32>
    %c16_i32_9 = arith.constant 16 : i32
    %86 = tpu.dynamic_rotate %8 by %c16_i32_9 dim 1 : vector<1x256xf32>, i32 -> vector<1x256xf32>
    %87 = arith.mulf %86, %85 : vector<1x256xf32>
    %c14 = arith.constant 14 : index
    %88 = memref.load %arg2[%c14] : memref<98xf32, #tpu.memory_space<smem>>
    %89 = vector.broadcast %88 : f32 to vector<1x256xf32>
    %90 = arith.mulf %89, %87 : vector<1x256xf32>
    %91 = arith.addf %54, %90 : vector<1x256xf32>
    %c15 = arith.constant 15 : index
    %92 = memref.load %arg2[%c15] : memref<98xf32, #tpu.memory_space<smem>>
    %93 = vector.broadcast %92 : f32 to vector<1x256xf32>
    %94 = arith.mulf %93, %87 : vector<1x256xf32>
    %95 = arith.addf %58, %94 : vector<1x256xf32>
    %c16 = arith.constant 16 : index
    %96 = memref.load %arg2[%c16] : memref<98xf32, #tpu.memory_space<smem>>
    %97 = vector.broadcast %96 : f32 to vector<1x256xf32>
    %98 = arith.mulf %97, %87 : vector<1x256xf32>
    %99 = arith.addf %62, %98 : vector<1x256xf32>
    %c17 = arith.constant 17 : index
    %100 = memref.load %arg2[%c17] : memref<98xf32, #tpu.memory_space<smem>>
    %101 = vector.broadcast %100 : f32 to vector<1x256xf32>
    %102 = arith.mulf %101, %87 : vector<1x256xf32>
    %103 = arith.addf %66, %102 : vector<1x256xf32>
    %c18 = arith.constant 18 : index
    %104 = memref.load %arg2[%c18] : memref<98xf32, #tpu.memory_space<smem>>
    %105 = vector.broadcast %104 : f32 to vector<1x256xf32>
    %106 = arith.mulf %105, %87 : vector<1x256xf32>
    %107 = arith.addf %70, %106 : vector<1x256xf32>
    %c19 = arith.constant 19 : index
    %108 = memref.load %arg2[%c19] : memref<98xf32, #tpu.memory_space<smem>>
    %109 = vector.broadcast %108 : f32 to vector<1x256xf32>
    %110 = arith.mulf %109, %87 : vector<1x256xf32>
    %111 = arith.addf %74, %110 : vector<1x256xf32>
    %c20 = arith.constant 20 : index
    %112 = memref.load %arg2[%c20] : memref<98xf32, #tpu.memory_space<smem>>
    %113 = vector.broadcast %112 : f32 to vector<1x256xf32>
    %114 = arith.mulf %113, %87 : vector<1x256xf32>
    %115 = arith.addf %78, %114 : vector<1x256xf32>
    %c21 = arith.constant 21 : index
    %116 = memref.load %arg2[%c21] : memref<98xf32, #tpu.memory_space<smem>>
    %117 = vector.broadcast %116 : f32 to vector<1x256xf32>
    %118 = arith.mulf %117, %8 : vector<1x256xf32>
    %119 = arith.addf %91, %118 : vector<1x256xf32>
    %c22 = arith.constant 22 : index
    %120 = memref.load %arg2[%c22] : memref<98xf32, #tpu.memory_space<smem>>
    %121 = vector.broadcast %120 : f32 to vector<1x256xf32>
    %122 = arith.mulf %121, %8 : vector<1x256xf32>
    %123 = arith.addf %95, %122 : vector<1x256xf32>
    %c23 = arith.constant 23 : index
    %124 = memref.load %arg2[%c23] : memref<98xf32, #tpu.memory_space<smem>>
    %125 = vector.broadcast %124 : f32 to vector<1x256xf32>
    %126 = arith.mulf %125, %8 : vector<1x256xf32>
    %127 = arith.addf %99, %126 : vector<1x256xf32>
    %c24 = arith.constant 24 : index
    %128 = memref.load %arg2[%c24] : memref<98xf32, #tpu.memory_space<smem>>
    %129 = vector.broadcast %128 : f32 to vector<1x256xf32>
    %130 = arith.mulf %129, %8 : vector<1x256xf32>
    %131 = arith.addf %103, %130 : vector<1x256xf32>
    %c25 = arith.constant 25 : index
    %132 = memref.load %arg2[%c25] : memref<98xf32, #tpu.memory_space<smem>>
    %133 = vector.broadcast %132 : f32 to vector<1x256xf32>
    %134 = arith.mulf %133, %8 : vector<1x256xf32>
    %135 = arith.addf %107, %134 : vector<1x256xf32>
    %c26 = arith.constant 26 : index
    %136 = memref.load %arg2[%c26] : memref<98xf32, #tpu.memory_space<smem>>
    %137 = vector.broadcast %136 : f32 to vector<1x256xf32>
    %138 = arith.mulf %137, %8 : vector<1x256xf32>
    %139 = arith.addf %111, %138 : vector<1x256xf32>
    %c27 = arith.constant 27 : index
    %140 = memref.load %arg2[%c27] : memref<98xf32, #tpu.memory_space<smem>>
    %141 = vector.broadcast %140 : f32 to vector<1x256xf32>
    %142 = arith.mulf %141, %8 : vector<1x256xf32>
    %143 = arith.addf %115, %142 : vector<1x256xf32>
    %c-16_i32 = arith.constant -16 : i32
    %144 = vector.broadcast %c-16_i32 : i32 to vector<1x256xi32>
    %145 = arith.cmpi sge, %9, %144 : vector<1x256xi32>
    %c240_i32 = arith.constant 240 : i32
    %146 = vector.broadcast %c240_i32 : i32 to vector<1x256xi32>
    %147 = arith.cmpi slt, %9, %146 : vector<1x256xi32>
    %148 = arith.andi %145, %147 : vector<1x256xi1>
    %149 = arith.extui %148 : vector<1x256xi1> to vector<1x256xi32>
    %150 = arith.sitofp %149 : vector<1x256xi32> to vector<1x256xf32>
    %c240_i32_10 = arith.constant 240 : i32
    %151 = tpu.dynamic_rotate %8 by %c240_i32_10 dim 1 : vector<1x256xf32>, i32 -> vector<1x256xf32>
    %152 = arith.mulf %151, %150 : vector<1x256xf32>
    %c28 = arith.constant 28 : index
    %153 = memref.load %arg2[%c28] : memref<98xf32, #tpu.memory_space<smem>>
    %154 = vector.broadcast %153 : f32 to vector<1x256xf32>
    %155 = arith.mulf %154, %152 : vector<1x256xf32>
    %156 = arith.addf %119, %155 : vector<1x256xf32>
    %c29 = arith.constant 29 : index
    %157 = memref.load %arg2[%c29] : memref<98xf32, #tpu.memory_space<smem>>
    %158 = vector.broadcast %157 : f32 to vector<1x256xf32>
    %159 = arith.mulf %158, %152 : vector<1x256xf32>
    %160 = arith.addf %123, %159 : vector<1x256xf32>
    %c30 = arith.constant 30 : index
    %161 = memref.load %arg2[%c30] : memref<98xf32, #tpu.memory_space<smem>>
    %162 = vector.broadcast %161 : f32 to vector<1x256xf32>
    %163 = arith.mulf %162, %152 : vector<1x256xf32>
    %164 = arith.addf %127, %163 : vector<1x256xf32>
    %c31 = arith.constant 31 : index
    %165 = memref.load %arg2[%c31] : memref<98xf32, #tpu.memory_space<smem>>
    %166 = vector.broadcast %165 : f32 to vector<1x256xf32>
    %167 = arith.mulf %166, %152 : vector<1x256xf32>
    %168 = arith.addf %131, %167 : vector<1x256xf32>
    %c32 = arith.constant 32 : index
    %169 = memref.load %arg2[%c32] : memref<98xf32, #tpu.memory_space<smem>>
    %170 = vector.broadcast %169 : f32 to vector<1x256xf32>
    %171 = arith.mulf %170, %152 : vector<1x256xf32>
    %172 = arith.addf %135, %171 : vector<1x256xf32>
    %c33 = arith.constant 33 : index
    %173 = memref.load %arg2[%c33] : memref<98xf32, #tpu.memory_space<smem>>
    %174 = vector.broadcast %173 : f32 to vector<1x256xf32>
    %175 = arith.mulf %174, %152 : vector<1x256xf32>
    %176 = arith.addf %139, %175 : vector<1x256xf32>
    %c34 = arith.constant 34 : index
    %177 = memref.load %arg2[%c34] : memref<98xf32, #tpu.memory_space<smem>>
    %178 = vector.broadcast %177 : f32 to vector<1x256xf32>
    %179 = arith.mulf %178, %152 : vector<1x256xf32>
    %180 = arith.addf %143, %179 : vector<1x256xf32>
    %c-32_i32 = arith.constant -32 : i32
    %181 = vector.broadcast %c-32_i32 : i32 to vector<1x256xi32>
    %182 = arith.cmpi sge, %9, %181 : vector<1x256xi32>
    %c224_i32 = arith.constant 224 : i32
    %183 = vector.broadcast %c224_i32 : i32 to vector<1x256xi32>
    %184 = arith.cmpi slt, %9, %183 : vector<1x256xi32>
    %185 = arith.andi %182, %184 : vector<1x256xi1>
    %186 = arith.extui %185 : vector<1x256xi1> to vector<1x256xi32>
    %187 = arith.sitofp %186 : vector<1x256xi32> to vector<1x256xf32>
    %c224_i32_11 = arith.constant 224 : i32
    %188 = tpu.dynamic_rotate %8 by %c224_i32_11 dim 1 : vector<1x256xf32>, i32 -> vector<1x256xf32>
    %189 = arith.mulf %188, %187 : vector<1x256xf32>
    %c35 = arith.constant 35 : index
    %190 = memref.load %arg2[%c35] : memref<98xf32, #tpu.memory_space<smem>>
    %191 = vector.broadcast %190 : f32 to vector<1x256xf32>
    %192 = arith.mulf %191, %189 : vector<1x256xf32>
    %193 = arith.addf %156, %192 : vector<1x256xf32>
    %c36 = arith.constant 36 : index
    %194 = memref.load %arg2[%c36] : memref<98xf32, #tpu.memory_space<smem>>
    %195 = vector.broadcast %194 : f32 to vector<1x256xf32>
    %196 = arith.mulf %195, %189 : vector<1x256xf32>
    %197 = arith.addf %160, %196 : vector<1x256xf32>
    %c37 = arith.constant 37 : index
    %198 = memref.load %arg2[%c37] : memref<98xf32, #tpu.memory_space<smem>>
    %199 = vector.broadcast %198 : f32 to vector<1x256xf32>
    %200 = arith.mulf %199, %189 : vector<1x256xf32>
    %201 = arith.addf %164, %200 : vector<1x256xf32>
    %c38 = arith.constant 38 : index
    %202 = memref.load %arg2[%c38] : memref<98xf32, #tpu.memory_space<smem>>
    %203 = vector.broadcast %202 : f32 to vector<1x256xf32>
    %204 = arith.mulf %203, %189 : vector<1x256xf32>
    %205 = arith.addf %168, %204 : vector<1x256xf32>
    %c39 = arith.constant 39 : index
    %206 = memref.load %arg2[%c39] : memref<98xf32, #tpu.memory_space<smem>>
    %207 = vector.broadcast %206 : f32 to vector<1x256xf32>
    %208 = arith.mulf %207, %189 : vector<1x256xf32>
    %209 = arith.addf %172, %208 : vector<1x256xf32>
    %c40 = arith.constant 40 : index
    %210 = memref.load %arg2[%c40] : memref<98xf32, #tpu.memory_space<smem>>
    %211 = vector.broadcast %210 : f32 to vector<1x256xf32>
    %212 = arith.mulf %211, %189 : vector<1x256xf32>
    %213 = arith.addf %176, %212 : vector<1x256xf32>
    %c41 = arith.constant 41 : index
    %214 = memref.load %arg2[%c41] : memref<98xf32, #tpu.memory_space<smem>>
    %215 = vector.broadcast %214 : f32 to vector<1x256xf32>
    %216 = arith.mulf %215, %189 : vector<1x256xf32>
    %217 = arith.addf %180, %216 : vector<1x256xf32>
    %c-48_i32 = arith.constant -48 : i32
    %218 = vector.broadcast %c-48_i32 : i32 to vector<1x256xi32>
    %219 = arith.cmpi sge, %9, %218 : vector<1x256xi32>
    %c208_i32 = arith.constant 208 : i32
    %220 = vector.broadcast %c208_i32 : i32 to vector<1x256xi32>
    %221 = arith.cmpi slt, %9, %220 : vector<1x256xi32>
    %222 = arith.andi %219, %221 : vector<1x256xi1>
    %223 = arith.extui %222 : vector<1x256xi1> to vector<1x256xi32>
    %224 = arith.sitofp %223 : vector<1x256xi32> to vector<1x256xf32>
    %c208_i32_12 = arith.constant 208 : i32
    %225 = tpu.dynamic_rotate %8 by %c208_i32_12 dim 1 : vector<1x256xf32>, i32 -> vector<1x256xf32>
    %226 = arith.mulf %225, %224 : vector<1x256xf32>
    %c42 = arith.constant 42 : index
    %227 = memref.load %arg2[%c42] : memref<98xf32, #tpu.memory_space<smem>>
    %228 = vector.broadcast %227 : f32 to vector<1x256xf32>
    %229 = arith.mulf %228, %226 : vector<1x256xf32>
    %230 = arith.addf %193, %229 : vector<1x256xf32>
    %c43 = arith.constant 43 : index
    %231 = memref.load %arg2[%c43] : memref<98xf32, #tpu.memory_space<smem>>
    %232 = vector.broadcast %231 : f32 to vector<1x256xf32>
    %233 = arith.mulf %232, %226 : vector<1x256xf32>
    %234 = arith.addf %197, %233 : vector<1x256xf32>
    %c44 = arith.constant 44 : index
    %235 = memref.load %arg2[%c44] : memref<98xf32, #tpu.memory_space<smem>>
    %236 = vector.broadcast %235 : f32 to vector<1x256xf32>
    %237 = arith.mulf %236, %226 : vector<1x256xf32>
    %238 = arith.addf %201, %237 : vector<1x256xf32>
    %c45 = arith.constant 45 : index
    %239 = memref.load %arg2[%c45] : memref<98xf32, #tpu.memory_space<smem>>
    %240 = vector.broadcast %239 : f32 to vector<1x256xf32>
    %241 = arith.mulf %240, %226 : vector<1x256xf32>
    %242 = arith.addf %205, %241 : vector<1x256xf32>
    %c46 = arith.constant 46 : index
    %243 = memref.load %arg2[%c46] : memref<98xf32, #tpu.memory_space<smem>>
    %244 = vector.broadcast %243 : f32 to vector<1x256xf32>
    %245 = arith.mulf %244, %226 : vector<1x256xf32>
    %246 = arith.addf %209, %245 : vector<1x256xf32>
    %c47 = arith.constant 47 : index
    %247 = memref.load %arg2[%c47] : memref<98xf32, #tpu.memory_space<smem>>
    %248 = vector.broadcast %247 : f32 to vector<1x256xf32>
    %249 = arith.mulf %248, %226 : vector<1x256xf32>
    %250 = arith.addf %213, %249 : vector<1x256xf32>
    %c48 = arith.constant 48 : index
    %251 = memref.load %arg2[%c48] : memref<98xf32, #tpu.memory_space<smem>>
    %252 = vector.broadcast %251 : f32 to vector<1x256xf32>
    %253 = arith.mulf %252, %226 : vector<1x256xf32>
    %254 = arith.addf %217, %253 : vector<1x256xf32>
    %c48_i32_13 = arith.constant 48 : i32
    %255 = vector.broadcast %c48_i32_13 : i32 to vector<1x256xi32>
    %256 = arith.cmpi sge, %9, %255 : vector<1x256xi32>
    %c304_i32_14 = arith.constant 304 : i32
    %257 = vector.broadcast %c304_i32_14 : i32 to vector<1x256xi32>
    %258 = arith.cmpi slt, %9, %257 : vector<1x256xi32>
    %259 = arith.andi %256, %258 : vector<1x256xi1>
    %260 = arith.extui %259 : vector<1x256xi1> to vector<1x256xi32>
    %261 = arith.sitofp %260 : vector<1x256xi32> to vector<1x256xf32>
    %c48_i32_15 = arith.constant 48 : i32
    %262 = tpu.dynamic_rotate %6 by %c48_i32_15 dim 1 : vector<1x256xf32>, i32 -> vector<1x256xf32>
    %263 = arith.mulf %262, %261 : vector<1x256xf32>
    %c49 = arith.constant 49 : index
    %264 = memref.load %arg2[%c49] : memref<98xf32, #tpu.memory_space<smem>>
    %265 = vector.broadcast %264 : f32 to vector<1x256xf32>
    %266 = arith.mulf %265, %263 : vector<1x256xf32>
    %267 = arith.addf %230, %266 : vector<1x256xf32>
    %c50 = arith.constant 50 : index
    %268 = memref.load %arg2[%c50] : memref<98xf32, #tpu.memory_space<smem>>
    %269 = vector.broadcast %268 : f32 to vector<1x256xf32>
    %270 = arith.mulf %269, %263 : vector<1x256xf32>
    %271 = arith.addf %234, %270 : vector<1x256xf32>
    %c51 = arith.constant 51 : index
    %272 = memref.load %arg2[%c51] : memref<98xf32, #tpu.memory_space<smem>>
    %273 = vector.broadcast %272 : f32 to vector<1x256xf32>
    %274 = arith.mulf %273, %263 : vector<1x256xf32>
    %275 = arith.addf %238, %274 : vector<1x256xf32>
    %c52 = arith.constant 52 : index
    %276 = memref.load %arg2[%c52] : memref<98xf32, #tpu.memory_space<smem>>
    %277 = vector.broadcast %276 : f32 to vector<1x256xf32>
    %278 = arith.mulf %277, %263 : vector<1x256xf32>
    %279 = arith.addf %242, %278 : vector<1x256xf32>
    %c53 = arith.constant 53 : index
    %280 = memref.load %arg2[%c53] : memref<98xf32, #tpu.memory_space<smem>>
    %281 = vector.broadcast %280 : f32 to vector<1x256xf32>
    %282 = arith.mulf %281, %263 : vector<1x256xf32>
    %283 = arith.addf %246, %282 : vector<1x256xf32>
    %c54 = arith.constant 54 : index
    %284 = memref.load %arg2[%c54] : memref<98xf32, #tpu.memory_space<smem>>
    %285 = vector.broadcast %284 : f32 to vector<1x256xf32>
    %286 = arith.mulf %285, %263 : vector<1x256xf32>
    %287 = arith.addf %250, %286 : vector<1x256xf32>
    %c55 = arith.constant 55 : index
    %288 = memref.load %arg2[%c55] : memref<98xf32, #tpu.memory_space<smem>>
    %289 = vector.broadcast %288 : f32 to vector<1x256xf32>
    %290 = arith.mulf %289, %263 : vector<1x256xf32>
    %291 = arith.addf %254, %290 : vector<1x256xf32>
    %c32_i32_16 = arith.constant 32 : i32
    %292 = vector.broadcast %c32_i32_16 : i32 to vector<1x256xi32>
    %293 = arith.cmpi sge, %9, %292 : vector<1x256xi32>
    %c288_i32_17 = arith.constant 288 : i32
    %294 = vector.broadcast %c288_i32_17 : i32 to vector<1x256xi32>
    %295 = arith.cmpi slt, %9, %294 : vector<1x256xi32>
    %296 = arith.andi %293, %295 : vector<1x256xi1>
    %297 = arith.extui %296 : vector<1x256xi1> to vector<1x256xi32>
    %298 = arith.sitofp %297 : vector<1x256xi32> to vector<1x256xf32>
    %c32_i32_18 = arith.constant 32 : i32
    %299 = tpu.dynamic_rotate %6 by %c32_i32_18 dim 1 : vector<1x256xf32>, i32 -> vector<1x256xf32>
    %300 = arith.mulf %299, %298 : vector<1x256xf32>
    %c56 = arith.constant 56 : index
    %301 = memref.load %arg2[%c56] : memref<98xf32, #tpu.memory_space<smem>>
    %302 = vector.broadcast %301 : f32 to vector<1x256xf32>
    %303 = arith.mulf %302, %300 : vector<1x256xf32>
    %304 = arith.addf %267, %303 : vector<1x256xf32>
    %c57 = arith.constant 57 : index
    %305 = memref.load %arg2[%c57] : memref<98xf32, #tpu.memory_space<smem>>
    %306 = vector.broadcast %305 : f32 to vector<1x256xf32>
    %307 = arith.mulf %306, %300 : vector<1x256xf32>
    %308 = arith.addf %271, %307 : vector<1x256xf32>
    %c58 = arith.constant 58 : index
    %309 = memref.load %arg2[%c58] : memref<98xf32, #tpu.memory_space<smem>>
    %310 = vector.broadcast %309 : f32 to vector<1x256xf32>
    %311 = arith.mulf %310, %300 : vector<1x256xf32>
    %312 = arith.addf %275, %311 : vector<1x256xf32>
    %c59 = arith.constant 59 : index
    %313 = memref.load %arg2[%c59] : memref<98xf32, #tpu.memory_space<smem>>
    %314 = vector.broadcast %313 : f32 to vector<1x256xf32>
    %315 = arith.mulf %314, %300 : vector<1x256xf32>
    %316 = arith.addf %279, %315 : vector<1x256xf32>
    %c60 = arith.constant 60 : index
    %317 = memref.load %arg2[%c60] : memref<98xf32, #tpu.memory_space<smem>>
    %318 = vector.broadcast %317 : f32 to vector<1x256xf32>
    %319 = arith.mulf %318, %300 : vector<1x256xf32>
    %320 = arith.addf %283, %319 : vector<1x256xf32>
    %c61 = arith.constant 61 : index
    %321 = memref.load %arg2[%c61] : memref<98xf32, #tpu.memory_space<smem>>
    %322 = vector.broadcast %321 : f32 to vector<1x256xf32>
    %323 = arith.mulf %322, %300 : vector<1x256xf32>
    %324 = arith.addf %287, %323 : vector<1x256xf32>
    %c62 = arith.constant 62 : index
    %325 = memref.load %arg2[%c62] : memref<98xf32, #tpu.memory_space<smem>>
    %326 = vector.broadcast %325 : f32 to vector<1x256xf32>
    %327 = arith.mulf %326, %300 : vector<1x256xf32>
    %328 = arith.addf %291, %327 : vector<1x256xf32>
    %c16_i32_19 = arith.constant 16 : i32
    %329 = vector.broadcast %c16_i32_19 : i32 to vector<1x256xi32>
    %330 = arith.cmpi sge, %9, %329 : vector<1x256xi32>
    %c272_i32_20 = arith.constant 272 : i32
    %331 = vector.broadcast %c272_i32_20 : i32 to vector<1x256xi32>
    %332 = arith.cmpi slt, %9, %331 : vector<1x256xi32>
    %333 = arith.andi %330, %332 : vector<1x256xi1>
    %334 = arith.extui %333 : vector<1x256xi1> to vector<1x256xi32>
    %335 = arith.sitofp %334 : vector<1x256xi32> to vector<1x256xf32>
    %c16_i32_21 = arith.constant 16 : i32
    %336 = tpu.dynamic_rotate %6 by %c16_i32_21 dim 1 : vector<1x256xf32>, i32 -> vector<1x256xf32>
    %337 = arith.mulf %336, %335 : vector<1x256xf32>
    %c63 = arith.constant 63 : index
    %338 = memref.load %arg2[%c63] : memref<98xf32, #tpu.memory_space<smem>>
    %339 = vector.broadcast %338 : f32 to vector<1x256xf32>
    %340 = arith.mulf %339, %337 : vector<1x256xf32>
    %341 = arith.addf %304, %340 : vector<1x256xf32>
    %c64 = arith.constant 64 : index
    %342 = memref.load %arg2[%c64] : memref<98xf32, #tpu.memory_space<smem>>
    %343 = vector.broadcast %342 : f32 to vector<1x256xf32>
    %344 = arith.mulf %343, %337 : vector<1x256xf32>
    %345 = arith.addf %308, %344 : vector<1x256xf32>
    %c65 = arith.constant 65 : index
    %346 = memref.load %arg2[%c65] : memref<98xf32, #tpu.memory_space<smem>>
    %347 = vector.broadcast %346 : f32 to vector<1x256xf32>
    %348 = arith.mulf %347, %337 : vector<1x256xf32>
    %349 = arith.addf %312, %348 : vector<1x256xf32>
    %c66 = arith.constant 66 : index
    %350 = memref.load %arg2[%c66] : memref<98xf32, #tpu.memory_space<smem>>
    %351 = vector.broadcast %350 : f32 to vector<1x256xf32>
    %352 = arith.mulf %351, %337 : vector<1x256xf32>
    %353 = arith.addf %316, %352 : vector<1x256xf32>
    %c67 = arith.constant 67 : index
    %354 = memref.load %arg2[%c67] : memref<98xf32, #tpu.memory_space<smem>>
    %355 = vector.broadcast %354 : f32 to vector<1x256xf32>
    %356 = arith.mulf %355, %337 : vector<1x256xf32>
    %357 = arith.addf %320, %356 : vector<1x256xf32>
    %c68 = arith.constant 68 : index
    %358 = memref.load %arg2[%c68] : memref<98xf32, #tpu.memory_space<smem>>
    %359 = vector.broadcast %358 : f32 to vector<1x256xf32>
    %360 = arith.mulf %359, %337 : vector<1x256xf32>
    %361 = arith.addf %324, %360 : vector<1x256xf32>
    %c69 = arith.constant 69 : index
    %362 = memref.load %arg2[%c69] : memref<98xf32, #tpu.memory_space<smem>>
    %363 = vector.broadcast %362 : f32 to vector<1x256xf32>
    %364 = arith.mulf %363, %337 : vector<1x256xf32>
    %365 = arith.addf %328, %364 : vector<1x256xf32>
    %c70 = arith.constant 70 : index
    %366 = memref.load %arg2[%c70] : memref<98xf32, #tpu.memory_space<smem>>
    %367 = vector.broadcast %366 : f32 to vector<1x256xf32>
    %368 = arith.mulf %367, %6 : vector<1x256xf32>
    %369 = arith.addf %341, %368 : vector<1x256xf32>
    %c71 = arith.constant 71 : index
    %370 = memref.load %arg2[%c71] : memref<98xf32, #tpu.memory_space<smem>>
    %371 = vector.broadcast %370 : f32 to vector<1x256xf32>
    %372 = arith.mulf %371, %6 : vector<1x256xf32>
    %373 = arith.addf %345, %372 : vector<1x256xf32>
    %c72 = arith.constant 72 : index
    %374 = memref.load %arg2[%c72] : memref<98xf32, #tpu.memory_space<smem>>
    %375 = vector.broadcast %374 : f32 to vector<1x256xf32>
    %376 = arith.mulf %375, %6 : vector<1x256xf32>
    %377 = arith.addf %349, %376 : vector<1x256xf32>
    %c73 = arith.constant 73 : index
    %378 = memref.load %arg2[%c73] : memref<98xf32, #tpu.memory_space<smem>>
    %379 = vector.broadcast %378 : f32 to vector<1x256xf32>
    %380 = arith.mulf %379, %6 : vector<1x256xf32>
    %381 = arith.addf %353, %380 : vector<1x256xf32>
    %c74 = arith.constant 74 : index
    %382 = memref.load %arg2[%c74] : memref<98xf32, #tpu.memory_space<smem>>
    %383 = vector.broadcast %382 : f32 to vector<1x256xf32>
    %384 = arith.mulf %383, %6 : vector<1x256xf32>
    %385 = arith.addf %357, %384 : vector<1x256xf32>
    %c75 = arith.constant 75 : index
    %386 = memref.load %arg2[%c75] : memref<98xf32, #tpu.memory_space<smem>>
    %387 = vector.broadcast %386 : f32 to vector<1x256xf32>
    %388 = arith.mulf %387, %6 : vector<1x256xf32>
    %389 = arith.addf %361, %388 : vector<1x256xf32>
    %c76 = arith.constant 76 : index
    %390 = memref.load %arg2[%c76] : memref<98xf32, #tpu.memory_space<smem>>
    %391 = vector.broadcast %390 : f32 to vector<1x256xf32>
    %392 = arith.mulf %391, %6 : vector<1x256xf32>
    %393 = arith.addf %365, %392 : vector<1x256xf32>
    %c-16_i32_22 = arith.constant -16 : i32
    %394 = vector.broadcast %c-16_i32_22 : i32 to vector<1x256xi32>
    %395 = arith.cmpi sge, %9, %394 : vector<1x256xi32>
    %c240_i32_23 = arith.constant 240 : i32
    %396 = vector.broadcast %c240_i32_23 : i32 to vector<1x256xi32>
    %397 = arith.cmpi slt, %9, %396 : vector<1x256xi32>
    %398 = arith.andi %395, %397 : vector<1x256xi1>
    %399 = arith.extui %398 : vector<1x256xi1> to vector<1x256xi32>
    %400 = arith.sitofp %399 : vector<1x256xi32> to vector<1x256xf32>
    %c240_i32_24 = arith.constant 240 : i32
    %401 = tpu.dynamic_rotate %6 by %c240_i32_24 dim 1 : vector<1x256xf32>, i32 -> vector<1x256xf32>
    %402 = arith.mulf %401, %400 : vector<1x256xf32>
    %c77 = arith.constant 77 : index
    %403 = memref.load %arg2[%c77] : memref<98xf32, #tpu.memory_space<smem>>
    %404 = vector.broadcast %403 : f32 to vector<1x256xf32>
    %405 = arith.mulf %404, %402 : vector<1x256xf32>
    %406 = arith.addf %369, %405 : vector<1x256xf32>
    %c78 = arith.constant 78 : index
    %407 = memref.load %arg2[%c78] : memref<98xf32, #tpu.memory_space<smem>>
    %408 = vector.broadcast %407 : f32 to vector<1x256xf32>
    %409 = arith.mulf %408, %402 : vector<1x256xf32>
    %410 = arith.addf %373, %409 : vector<1x256xf32>
    %c79 = arith.constant 79 : index
    %411 = memref.load %arg2[%c79] : memref<98xf32, #tpu.memory_space<smem>>
    %412 = vector.broadcast %411 : f32 to vector<1x256xf32>
    %413 = arith.mulf %412, %402 : vector<1x256xf32>
    %414 = arith.addf %377, %413 : vector<1x256xf32>
    %c80 = arith.constant 80 : index
    %415 = memref.load %arg2[%c80] : memref<98xf32, #tpu.memory_space<smem>>
    %416 = vector.broadcast %415 : f32 to vector<1x256xf32>
    %417 = arith.mulf %416, %402 : vector<1x256xf32>
    %418 = arith.addf %381, %417 : vector<1x256xf32>
    %c81 = arith.constant 81 : index
    %419 = memref.load %arg2[%c81] : memref<98xf32, #tpu.memory_space<smem>>
    %420 = vector.broadcast %419 : f32 to vector<1x256xf32>
    %421 = arith.mulf %420, %402 : vector<1x256xf32>
    %422 = arith.addf %385, %421 : vector<1x256xf32>
    %c82 = arith.constant 82 : index
    %423 = memref.load %arg2[%c82] : memref<98xf32, #tpu.memory_space<smem>>
    %424 = vector.broadcast %423 : f32 to vector<1x256xf32>
    %425 = arith.mulf %424, %402 : vector<1x256xf32>
    %426 = arith.addf %389, %425 : vector<1x256xf32>
    %c83 = arith.constant 83 : index
    %427 = memref.load %arg2[%c83] : memref<98xf32, #tpu.memory_space<smem>>
    %428 = vector.broadcast %427 : f32 to vector<1x256xf32>
    %429 = arith.mulf %428, %402 : vector<1x256xf32>
    %430 = arith.addf %393, %429 : vector<1x256xf32>
    %c-32_i32_25 = arith.constant -32 : i32
    %431 = vector.broadcast %c-32_i32_25 : i32 to vector<1x256xi32>
    %432 = arith.cmpi sge, %9, %431 : vector<1x256xi32>
    %c224_i32_26 = arith.constant 224 : i32
    %433 = vector.broadcast %c224_i32_26 : i32 to vector<1x256xi32>
    %434 = arith.cmpi slt, %9, %433 : vector<1x256xi32>
    %435 = arith.andi %432, %434 : vector<1x256xi1>
    %436 = arith.extui %435 : vector<1x256xi1> to vector<1x256xi32>
    %437 = arith.sitofp %436 : vector<1x256xi32> to vector<1x256xf32>
    %c224_i32_27 = arith.constant 224 : i32
    %438 = tpu.dynamic_rotate %6 by %c224_i32_27 dim 1 : vector<1x256xf32>, i32 -> vector<1x256xf32>
    %439 = arith.mulf %438, %437 : vector<1x256xf32>
    %c84 = arith.constant 84 : index
    %440 = memref.load %arg2[%c84] : memref<98xf32, #tpu.memory_space<smem>>
    %441 = vector.broadcast %440 : f32 to vector<1x256xf32>
    %442 = arith.mulf %441, %439 : vector<1x256xf32>
    %443 = arith.addf %406, %442 : vector<1x256xf32>
    %c85 = arith.constant 85 : index
    %444 = memref.load %arg2[%c85] : memref<98xf32, #tpu.memory_space<smem>>
    %445 = vector.broadcast %444 : f32 to vector<1x256xf32>
    %446 = arith.mulf %445, %439 : vector<1x256xf32>
    %447 = arith.addf %410, %446 : vector<1x256xf32>
    %c86 = arith.constant 86 : index
    %448 = memref.load %arg2[%c86] : memref<98xf32, #tpu.memory_space<smem>>
    %449 = vector.broadcast %448 : f32 to vector<1x256xf32>
    %450 = arith.mulf %449, %439 : vector<1x256xf32>
    %451 = arith.addf %414, %450 : vector<1x256xf32>
    %c87 = arith.constant 87 : index
    %452 = memref.load %arg2[%c87] : memref<98xf32, #tpu.memory_space<smem>>
    %453 = vector.broadcast %452 : f32 to vector<1x256xf32>
    %454 = arith.mulf %453, %439 : vector<1x256xf32>
    %455 = arith.addf %418, %454 : vector<1x256xf32>
    %c88 = arith.constant 88 : index
    %456 = memref.load %arg2[%c88] : memref<98xf32, #tpu.memory_space<smem>>
    %457 = vector.broadcast %456 : f32 to vector<1x256xf32>
    %458 = arith.mulf %457, %439 : vector<1x256xf32>
    %459 = arith.addf %422, %458 : vector<1x256xf32>
    %c89 = arith.constant 89 : index
    %460 = memref.load %arg2[%c89] : memref<98xf32, #tpu.memory_space<smem>>
    %461 = vector.broadcast %460 : f32 to vector<1x256xf32>
    %462 = arith.mulf %461, %439 : vector<1x256xf32>
    %463 = arith.addf %426, %462 : vector<1x256xf32>
    %c90 = arith.constant 90 : index
    %464 = memref.load %arg2[%c90] : memref<98xf32, #tpu.memory_space<smem>>
    %465 = vector.broadcast %464 : f32 to vector<1x256xf32>
    %466 = arith.mulf %465, %439 : vector<1x256xf32>
    %467 = arith.addf %430, %466 : vector<1x256xf32>
    %c-48_i32_28 = arith.constant -48 : i32
    %468 = vector.broadcast %c-48_i32_28 : i32 to vector<1x256xi32>
    %469 = arith.cmpi sge, %9, %468 : vector<1x256xi32>
    %c208_i32_29 = arith.constant 208 : i32
    %470 = vector.broadcast %c208_i32_29 : i32 to vector<1x256xi32>
    %471 = arith.cmpi slt, %9, %470 : vector<1x256xi32>
    %472 = arith.andi %469, %471 : vector<1x256xi1>
    %473 = arith.extui %472 : vector<1x256xi1> to vector<1x256xi32>
    %474 = arith.sitofp %473 : vector<1x256xi32> to vector<1x256xf32>
    %c208_i32_30 = arith.constant 208 : i32
    %475 = tpu.dynamic_rotate %6 by %c208_i32_30 dim 1 : vector<1x256xf32>, i32 -> vector<1x256xf32>
    %476 = arith.mulf %475, %474 : vector<1x256xf32>
    %c91 = arith.constant 91 : index
    %477 = memref.load %arg2[%c91] : memref<98xf32, #tpu.memory_space<smem>>
    %478 = vector.broadcast %477 : f32 to vector<1x256xf32>
    %479 = arith.mulf %478, %476 : vector<1x256xf32>
    %480 = arith.addf %443, %479 : vector<1x256xf32>
    %c92 = arith.constant 92 : index
    %481 = memref.load %arg2[%c92] : memref<98xf32, #tpu.memory_space<smem>>
    %482 = vector.broadcast %481 : f32 to vector<1x256xf32>
    %483 = arith.mulf %482, %476 : vector<1x256xf32>
    %484 = arith.addf %447, %483 : vector<1x256xf32>
    %c93 = arith.constant 93 : index
    %485 = memref.load %arg2[%c93] : memref<98xf32, #tpu.memory_space<smem>>
    %486 = vector.broadcast %485 : f32 to vector<1x256xf32>
    %487 = arith.mulf %486, %476 : vector<1x256xf32>
    %488 = arith.addf %451, %487 : vector<1x256xf32>
    %c94 = arith.constant 94 : index
    %489 = memref.load %arg2[%c94] : memref<98xf32, #tpu.memory_space<smem>>
    %490 = vector.broadcast %489 : f32 to vector<1x256xf32>
    %491 = arith.mulf %490, %476 : vector<1x256xf32>
    %492 = arith.addf %455, %491 : vector<1x256xf32>
    %c95 = arith.constant 95 : index
    %493 = memref.load %arg2[%c95] : memref<98xf32, #tpu.memory_space<smem>>
    %494 = vector.broadcast %493 : f32 to vector<1x256xf32>
    %495 = arith.mulf %494, %476 : vector<1x256xf32>
    %496 = arith.addf %459, %495 : vector<1x256xf32>
    %c96 = arith.constant 96 : index
    %497 = memref.load %arg2[%c96] : memref<98xf32, #tpu.memory_space<smem>>
    %498 = vector.broadcast %497 : f32 to vector<1x256xf32>
    %499 = arith.mulf %498, %476 : vector<1x256xf32>
    %500 = arith.addf %463, %499 : vector<1x256xf32>
    %c97 = arith.constant 97 : index
    %501 = memref.load %arg2[%c97] : memref<98xf32, #tpu.memory_space<smem>>
    %502 = vector.broadcast %501 : f32 to vector<1x256xf32>
    %503 = arith.mulf %502, %476 : vector<1x256xf32>
    %504 = arith.addf %467, %503 : vector<1x256xf32>
    %cst_31 = arith.constant 0.000000e+00 : f32
    %505 = vector.broadcast %cst_31 : f32 to vector<1x256xf32>
    %c0_32 = arith.constant 0 : index
    %506 = memref.load %arg3[%c0_32] : memref<1xf32, #tpu.memory_space<smem>>
    %507 = vector.broadcast %506 : f32 to vector<1x256xf32>
    %508 = arith.addf %505, %507 : vector<1x256xf32>
    %c3_i32 = arith.constant 3 : i32
    %509 = vector.broadcast %c3_i32 : i32 to vector<1x256xi32>
    %510 = arith.cmpi sge, %11, %509 : vector<1x256xi32>
    %c19_i32 = arith.constant 19 : i32
    %511 = vector.broadcast %c19_i32 : i32 to vector<1x256xi32>
    %512 = arith.cmpi slt, %11, %511 : vector<1x256xi32>
    %513 = arith.andi %510, %512 : vector<1x256xi1>
    %514 = arith.extui %513 : vector<1x256xi1> to vector<1x256xi32>
    %515 = arith.sitofp %514 : vector<1x256xi32> to vector<1x256xf32>
    %c3_i32_33 = arith.constant 3 : i32
    %516 = tpu.dynamic_rotate %480 by %c3_i32_33 dim 1 : vector<1x256xf32>, i32 -> vector<1x256xf32>
    %517 = arith.mulf %515, %516 : vector<1x256xf32>
    %518 = arith.addf %508, %517 : vector<1x256xf32>
    %c2_i32 = arith.constant 2 : i32
    %519 = vector.broadcast %c2_i32 : i32 to vector<1x256xi32>
    %520 = arith.cmpi sge, %11, %519 : vector<1x256xi32>
    %c18_i32 = arith.constant 18 : i32
    %521 = vector.broadcast %c18_i32 : i32 to vector<1x256xi32>
    %522 = arith.cmpi slt, %11, %521 : vector<1x256xi32>
    %523 = arith.andi %520, %522 : vector<1x256xi1>
    %524 = arith.extui %523 : vector<1x256xi1> to vector<1x256xi32>
    %525 = arith.sitofp %524 : vector<1x256xi32> to vector<1x256xf32>
    %c2_i32_34 = arith.constant 2 : i32
    %526 = tpu.dynamic_rotate %484 by %c2_i32_34 dim 1 : vector<1x256xf32>, i32 -> vector<1x256xf32>
    %527 = arith.mulf %525, %526 : vector<1x256xf32>
    %528 = arith.addf %518, %527 : vector<1x256xf32>
    %c1_i32 = arith.constant 1 : i32
    %529 = vector.broadcast %c1_i32 : i32 to vector<1x256xi32>
    %530 = arith.cmpi sge, %11, %529 : vector<1x256xi32>
    %c17_i32 = arith.constant 17 : i32
    %531 = vector.broadcast %c17_i32 : i32 to vector<1x256xi32>
    %532 = arith.cmpi slt, %11, %531 : vector<1x256xi32>
    %533 = arith.andi %530, %532 : vector<1x256xi1>
    %534 = arith.extui %533 : vector<1x256xi1> to vector<1x256xi32>
    %535 = arith.sitofp %534 : vector<1x256xi32> to vector<1x256xf32>
    %c1_i32_35 = arith.constant 1 : i32
    %536 = tpu.dynamic_rotate %488 by %c1_i32_35 dim 1 : vector<1x256xf32>, i32 -> vector<1x256xf32>
    %537 = arith.mulf %535, %536 : vector<1x256xf32>
    %538 = arith.addf %528, %537 : vector<1x256xf32>
    %539 = arith.addf %538, %492 : vector<1x256xf32>
    %c-1_i32 = arith.constant -1 : i32
    %540 = vector.broadcast %c-1_i32 : i32 to vector<1x256xi32>
    %541 = arith.cmpi sge, %11, %540 : vector<1x256xi32>
    %c15_i32_36 = arith.constant 15 : i32
    %542 = vector.broadcast %c15_i32_36 : i32 to vector<1x256xi32>
    %543 = arith.cmpi slt, %11, %542 : vector<1x256xi32>
    %544 = arith.andi %541, %543 : vector<1x256xi1>
    %545 = arith.extui %544 : vector<1x256xi1> to vector<1x256xi32>
    %546 = arith.sitofp %545 : vector<1x256xi32> to vector<1x256xf32>
    %c255_i32 = arith.constant 255 : i32
    %547 = tpu.dynamic_rotate %496 by %c255_i32 dim 1 : vector<1x256xf32>, i32 -> vector<1x256xf32>
    %548 = arith.mulf %546, %547 : vector<1x256xf32>
    %549 = arith.addf %539, %548 : vector<1x256xf32>
    %c-2_i32 = arith.constant -2 : i32
    %550 = vector.broadcast %c-2_i32 : i32 to vector<1x256xi32>
    %551 = arith.cmpi sge, %11, %550 : vector<1x256xi32>
    %c14_i32 = arith.constant 14 : i32
    %552 = vector.broadcast %c14_i32 : i32 to vector<1x256xi32>
    %553 = arith.cmpi slt, %11, %552 : vector<1x256xi32>
    %554 = arith.andi %551, %553 : vector<1x256xi1>
    %555 = arith.extui %554 : vector<1x256xi1> to vector<1x256xi32>
    %556 = arith.sitofp %555 : vector<1x256xi32> to vector<1x256xf32>
    %c254_i32 = arith.constant 254 : i32
    %557 = tpu.dynamic_rotate %500 by %c254_i32 dim 1 : vector<1x256xf32>, i32 -> vector<1x256xf32>
    %558 = arith.mulf %556, %557 : vector<1x256xf32>
    %559 = arith.addf %549, %558 : vector<1x256xf32>
    %c-3_i32 = arith.constant -3 : i32
    %560 = vector.broadcast %c-3_i32 : i32 to vector<1x256xi32>
    %561 = arith.cmpi sge, %11, %560 : vector<1x256xi32>
    %c13_i32 = arith.constant 13 : i32
    %562 = vector.broadcast %c13_i32 : i32 to vector<1x256xi32>
    %563 = arith.cmpi slt, %11, %562 : vector<1x256xi32>
    %564 = arith.andi %561, %563 : vector<1x256xi1>
    %565 = arith.extui %564 : vector<1x256xi1> to vector<1x256xi32>
    %566 = arith.sitofp %565 : vector<1x256xi32> to vector<1x256xf32>
    %c253_i32 = arith.constant 253 : i32
    %567 = tpu.dynamic_rotate %504 by %c253_i32 dim 1 : vector<1x256xf32>, i32 -> vector<1x256xf32>
    %568 = arith.mulf %566, %567 : vector<1x256xf32>
    %569 = arith.addf %559, %568 : vector<1x256xf32>
    %570 = arith.negf %569 : vector<1x256xf32>
    %571 = math.exp %570 : vector<1x256xf32>
    %cst_37 = arith.constant 1.000000e+00 : f32
    %572 = vector.broadcast %cst_37 : f32 to vector<1x256xf32>
    %573 = arith.addf %572, %571 : vector<1x256xf32>
    %574 = arith.divf %572, %573 : vector<1x256xf32>
    %c0_38 = arith.constant 0 : index
    %c0_39 = arith.constant 0 : index
    %c0_40 = arith.constant 0 : index
    %575 = vector.load %arg1[%c0_38, %c0_39, %c0_40] : memref<1x16x256xf32, #tpu.memory_space<vmem>>, vector<1x16x256xf32>
    %576 = vector.shape_cast %574 : vector<1x256xf32> to vector<1x1x256xf32>
    %577 = vector.broadcast %576 : vector<1x1x256xf32> to vector<1x16x256xf32>
    %578 = arith.mulf %575, %577 : vector<1x16x256xf32>
    %c0_41 = arith.constant 0 : index
    %c0_42 = arith.constant 0 : index
    %c0_43 = arith.constant 0 : index
    %579 = vector.load %arg4[%c0_41, %c0_42, %c0_43] : memref<1x16x256xf32, #tpu.memory_space<vmem>>, vector<1x16x256xf32>
    tpu.vector_store %arg4[%c0_41, %c0_42, %c0_43], %578 {strides = array<i32>} : memref<1x16x256xf32, #tpu.memory_space<vmem>>, vector<1x16x256xf32>,
    return
  }
  func.func @transform_0(%arg0: i32) -> (i32, i32, i32) {
    %c0_i32 = arith.constant 0 : i32
    %c0_i32_0 = arith.constant 0 : i32
    %c0_i32_1 = arith.constant 0 : i32
    return %arg0, %c0_i32, %c0_i32_0 : i32, i32, i32
  }
  func.func @transform_1(%arg0: i32) -> i32 {
    %c0_i32 = arith.constant 0 : i32
    %c0_i32_0 = arith.constant 0 : i32
    return %c0_i32 : i32
  }
  func.func @transform_2(%arg0: i32) -> i32 {
    %c0_i32 = arith.constant 0 : i32
    %c0_i32_0 = arith.constant 0 : i32
    return %c0_i32 : i32
  }
  func.func @transform_3(%arg0: i32) -> (i32, i32, i32) {
    %c0_i32 = arith.constant 0 : i32
    %c0_i32_0 = arith.constant 0 : i32
    %c0_i32_1 = arith.constant 0 : i32
    return %arg0, %c0_i32, %c0_i32_0 : i32, i32, i32
  }
}

</mosaic_0001>

<bundles_post_ra>
// kernel: tpu_custom_call.1
= control target key start
LH: loop header
LB: loop body
LE: loop exit
PB: predicated region body
PF: predicated region fallthrough
CT: control target
= control target key end

     0   :  { %s2848_s0 = inlined_call_operand.hbm [shape: f32[2,16,256], index: 0, kind: input, shape index: {}]   ;;  %s2849_s1 = inlined_call_operand.vmem [shape: f32[98], index: 1, kind: input, shape index: {}]   ;;  %s2850_s2 = inlined_call_operand.<no memory space> [shape: f32[1], index: 2, kind: input, shape index: {}]   ;;  %s2851_s3 = inlined_call_operand.hbm [shape: f32[2,16,256], index: 3, kind: output, shape index: {}]  }
   0x1   :  { %2898 = sst [smem:[#allocation46_spill]] %s2848_s0 }
   0x2   :  { %2899 = sst [smem:[#allocation47_spill]] %s2849_s1 }
   0x3   :  { %2900 = sst [smem:[#allocation48_spill]] %s2851_s3 }
   0x4   :  { %8 = sst [smem:[#allocation2]] %s2850_s2 }
   0x5   :  { %9 = vsyncpa [#allocation4], 0 }
   0x6   :  { %11 = vsyncpa [#allocation4 + $0x1], 0 }
   0x7   :  { %12 = vsyncpa [#allocation6], 0 }
   0x8   :  { %13 = vsyncpa [#allocation5], 0 }
   0x9   :  { %15 = vsyncpa [#allocation5 + $0x1], 0  ;;  %s1640_s14 = smov 0   ;;  %s1642_s15 = smov 0  }
   0xa   :  { %s1644_s16 = smov 0   ;;  %s1646_s17 = smov 0  }
   0xb LB: > { %2901 = sst [smem:[#allocation12_spill]] %s1586_s14  ;;  %s1661_s2 = sadd.s32 4294967295, %s1598_s17   ;;  %s1598_s17 = sphi %s1646_s17, %s3037_s17   ;;  %s1594_s16 = sphi %s1644_s16, %s3040_s16   ;;  %s1590_s15 = sphi %s1642_s15, %s3039_s15   ;;  %s1586_s14 = sphi %s1640_s14, %s3038_s14  }
   0xc   : > { %2902 = sst [smem:[#allocation13_spill]] %s1590_s15  ;;  %s1263_s18 = sadd.s32 4294967294, %s1598_s17  }
   0xd   : > { %2903 = sst [smem:[#allocation14_spill]] %s1594_s16  ;;  %s1665_s19 = sadd.s32 1, %s1598_s17  }
   0xe   : > { %2904 = sst [smem:[#allocation15_spill]] %s1598_s17  ;;  %s28_s20 = sadd.s32 1, %s1594_s16 }
   0xf   : > { %2905 = sst [smem:[#allocation16_spill]] %s1661_s2  ;;  %s25_s21 = ssub.s32 %s1598_s17, %s1665_s19 }
  0x10   : > { %2906 = sst [smem:[#allocation17_spill]] %s1665_s19  ;;  %p35_p0 = scmp.ne.s32.totalorder %s1594_s16, %s1590_s15 }
  0x11   : > { %p26_p1 = scmp.eq.s32.totalorder %s25_s21, 0  ;;  %p36_p2 = scmp.eq.s32.totalorder %s1598_s17, 0 }
  0x12   : > { %p41_p3 = scmp.ne.s32.totalorder %s1590_s15, %s1586_s14  ;;  %p42_p4 = scmp.eq.s32.totalorder %s1661_s2, 0 }
  0x13   : > { %s1677_s22 = scalar_select %p26_p1, %s1594_s16, %s28_s20  }
  0x14   : > { %p1679_p5 = por %p36_p2, %p35_p0  ;;  %p1685_p6 = por %p42_p4, %p41_p3 }
  0x15   : > { %2907 = sst [smem:[#allocation18_spill]] %s1677_s22  ;;  %p107_p7 = scmp.eq.s32.totalorder %s1661_s2, 1 }
  0x16   : > { %p113_p8 = scmp.eq.s32.totalorder %s1263_s18, 1  ;;  %p1264_p9 = scmp.ge.s32.totalorder %s1598_s17, 1 }
  0x17   : > { %p120_p10 = scmp.lt.s32.totalorder %s1598_s17, 3  ;;  %p1692_p11 = por %p107_p7, %p35_p0 }
  0x18   : > { %p1696_p12 = por %p113_p8, %p41_p3  ;;  %s2915_s1 = sld [smem:[#allocation47_spill]] }
  0x19   : > { %s2910_s25 = scalar_select %p1692_p11, 1, 0 }
  0x1a   : > { %s2912_s26 = scalar_select %p1696_p12, 1, 0 }
  0x1b   : > { %2911 = sst [smem:[#allocation19_spill]] %s2910_s25  ;;  %p1700_p13 = pnand %p1264_p9, %p120_p10 }
  0x1c   : > { %2913 = sst [smem:[#allocation20_spill]] %s2912_s26  ;;  %p1419_p2 = scmp.lt.s32.totalorder %s1598_s17, 2 }
  0x1d   : > { %p1406_p1 = pneg %p1700_p13  ;;  %s146_s4 = sand.u32 1, %s1594_s16  }
  0x1e   : > { %s132_s30 = sshll.u32 %s2915_s1, 4  ;;  %p1716_p3 = pnand %p1419_p2, %p1679_p5  ;;  %s133_s30 = int_to_ptr.vmem [resolvable:$true] %s132_s30 }
  0x1f   : > { %p1407_p7 = pnand %p1406_p1, %p42_p4  ;;  %s1267_s6 = sshll.u32 %s146_s4, 5 }
  0x20   : > { %s1600_s7 = smov [#allocation7]   ;;  %s1396_s8 = sshll.u32 %s1598_s17, 5 }
  0x21   : > { %1409 = dma.vmem_to_smem (!%p1407_p7), %s133_s30, 16, %s1600_s7, [#allocation6]  }
  0x22   : > { %s150_s9 = scalar_lea.vmem [#allocation3], %s1267_s6  ;;  %s2917_s0 = sld [smem:[#allocation46_spill]] }
  0x23   : > { %s158_s10 = sshll.u32 %s150_s9, 4  ;;  %s147_s20 = scalar_lea.sflag [#allocation4], %s146_s4  ;;  %s159_s10 = int_to_ptr.vmem [resolvable:$true] %s158_s10 }
  0x24   : > { %p1502_p8 = pneg %p1716_p3 }
  0x28   : > { %s155_s13 = scalar_lea.hbm %s2917_s0, %s1396_s8  ;;  %s1505_s30 = scalar_lea.hbm %s2917_s0, 64 }
  0x29   : > { %s156_s18 = sshll.u32 %s155_s13, 4  ;;  %s157_s18 = int_to_ptr.hbm [resolvable:$true] %s156_s18 }
  0x2a   : > { %s1498_s21 = sshra.s32 %s157_s18, 4  ;;  %s1499_s21 = int_to_ptr.hbm [resolvable:$true] %s1498_s21 }
  0x2b   : > { %s1500_s23 = scalar_lea.hbm %s1499_s21, 32  ;;  %p1506_p1 = scmp.lt.s32.totalorder %s1499_s21, %s2917_s0 }
  0x2c   : > { %p1501_p5 = scmp.ne.s32.totalorder %s1499_s21, %s1500_s23  ;;  %p1507_p2 = scmp.lt.s32.totalorder %s1505_s30, %s1500_s23 }
  0x2e   : > { %p1503_p9 = pnand %p1502_p8, %p1501_p5  ;;  %p1508_p7 = por %p1507_p2, %p1506_p1 }
  0x30   : > { %p1504_p10 = pneg %p1503_p9 }
  0x32   : > { %p1509_p0 = pnand %p1508_p7, %p1504_p10 }
  0x34   : > { %1512 = shalt.err (!%p1509_p0)
}
  0x35   : > { %s1601_s4 = smov 256   ;;  %s1602_s8 = smov 16  }
  0x36   : > { %1413 = dma.hbm_to_vmem [thread:$0]  (!%p1716_p3), %s157_s18, 512, %s159_s10, %s147_s20, %s1601_s4, %s1601_s4, %s1602_s8  }
  0x37   : > { %170 = sbr.rel (%p1700_p13) target bundleno = 497 (0x1f1), region = 32 }
  0x3c   : > { %s1737_s9 = sand.u32 1, %s1590_s15  }
  0x3d   : > { %2918 = sst [smem:[#allocation21_spill]] %s1737_s9  ;;  %s2853_s11 = sshll.u32 %s1737_s9, 5 }
  0x3e   : > { %s173_s12 = scalar_lea.sflag [#allocation4], %s1737_s9  ;;  %s1743_s13 = scalar_lea.vmem [#allocation3], %s2853_s11 }
  0x3f   : > { %2919 = sst [smem:[#allocation22_spill]] %s1743_s13 }
  0x40   : > { %1573 = dma.done.wait (%p1685_p6), %s173_s12, 512  }
  0x41   : > { %1575 = vsyncadd (%p1685_p6), %s173_s12, 4294966784 }
  0x42   : > { %1577 = dma.done.wait (%p42_p4), [#allocation6], 16  }
  0x43   : > { %1579 = vsyncadd (%p42_p4), [#allocation6], 4294967280 }
  0x44   : > { %187 = sfence }
  0x45   : > { %v206_v0 = vld [vmem:[%s1743_s13] sm:$0xff]  ;;  %v208_v1 = vld [vmem:[%s1743_s13 + $0x10] sm:$0xff]  ;;  %v207_v2 = vld [vmem:[%s1743_s13 + $0x8] sm:$0xff]  ;;  %s1603_s24 = smov 32   ;;  %s1604_s27 = smov 48   ;;  %v242_v35 = vlaneseq  ;;  %v2871_v45 = vmov 0.0  }
  0x46   : > { %v210_v3 = vadd.f32 %v208_v1, %v206_v0  ;;  %v209_v4 = vld [vmem:[%s1743_s13 + $0x18] sm:$0xff]  ;;  %s2852_s5 = smov 16   ;;  %v226_v21 = vmax.f32 %v206_v0, %v208_v1  ;;  %s1606_s10 = smov 112  }
  0x47   : > { %v217_v5 = vadd.f32 %v209_v4, %v207_v2  ;;  %v233_v20 = vmax.f32 %v207_v2, %v209_v4  ;;  %s1607_s18 = smov 96   ;;  %s1608_s20 = smov 80   ;;  %v1847_v36 = vand.u32 127, %v242_v35 }
  0x48   : > { %v211_v6 = vrot.slane %v210_v3, 4  ;;  %v227_v23 = vrot.slane %v226_v21, 4  ;;  %s1801_s21 = sld [smem:[#allocation7 + $0xe]] }
  0x49   : > { %v218_v7 = vrot.slane %v217_v5, 4  ;;  %v234_v22 = vrot.slane %v233_v20, 4  ;;  %s1803_s23 = sld [smem:[#allocation7 + $0xf]]  ;;  %2923 = vst [vmem:[#allocation26_spill] sm:$0xff] %v1847_v36  ;;  %vm355_vm0 = vcmp.ge.s32.totalorder %v1847_v36, 16  ;;  %vm369_vm1 = vcmp.lt.s32.totalorder %v1847_v36, 16 }
  0x4a   : > { %v212_v8 = vadd.f32 %v211_v6, %v210_v3  ;;  %v228_v25 = vmax.f32 %v226_v21, %v227_v23  ;;  %s1805_s28 = sld [smem:[#allocation7 + $0x10]]  ;;  %vm294_vm2 = vcmp.ge.s32.totalorder %v1847_v36, 32  ;;  %vm247_vm3 = vcmp.ge.s32.totalorder %v1847_v36, 48 }
  0x4b   : > { %v219_v9 = vadd.f32 %v218_v7, %v217_v5  ;;  %v235_v24 = vmax.f32 %v233_v20, %v234_v22  ;;  %s1807_s29 = sld [smem:[#allocation7 + $0x11]]  ;;  %v1877_v46 = vsel %vm355_vm0, 1.0, %v2871_v45  ;;  %v1882_v48 = vsel %vm294_vm2, 1.0, %v2871_v45 }
  0x4c   : > { %v213_v10 = vrot.slane %v212_v8, 2  ;;  %v229_v27 = vrot.slane %v228_v25, 2  ;;  %s1809_s30 = sld [smem:[#allocation7 + $0x12]]  ;;  %2924 = vst [vmem:[#allocation27_spill] sm:$0xff] %v1877_v46  ;;  %v1900_v57 = vsel %vm247_vm3, 1.0, %v2871_v45  ;;  %v1923_v5 = vadd.s32 128, %v1847_v36 }
  0x4d   : > { %v220_v11 = vrot.slane %v219_v9, 2  ;;  %v236_v26 = vrot.slane %v235_v24, 2  ;;  %s1811_s6 = sld [smem:[#allocation7 + $0x13]]  ;;  %2925 = vst [vmem:[#allocation28_spill] sm:$0xff] %v1882_v48  ;;  %vm308_vm4 = vcmp.lt.s32.totalorder %v1847_v36, 32  ;;  %vm261_vm5 = vcmp.lt.s32.totalorder %v1847_v36, 48 }
  0x4e   : > { %v214_v12 = vadd.f32 %v213_v10, %v212_v8  ;;  %v230_v29 = vmax.f32 %v228_v25, %v229_v27  ;;  %s1813_s7 = sld [smem:[#allocation7 + $0x14]]  ;;  %v375_v38 = vstv %s1801_s21  ;;  %2926 = vst [vmem:[#allocation29_spill] sm:$0xff] %v1900_v57  ;;  %vm461_vm6 = vcmp.lt.s32.totalorder %v1923_v5, 240 }
  0x4f   : > { %v221_v13 = vadd.f32 %v220_v11, %v219_v9  ;;  %v237_v28 = vmax.f32 %v235_v24, %v236_v26  ;;  %s1815_s4 = sld [smem:[#allocation7 + $0x7]]  ;;  %v381_v39 = vstv %s1803_s23  ;;  %2927 = vst [vmem:[#allocation30_spill] sm:$0xff] %v1923_v5  ;;  %vm522_vm7 = vcmp.lt.s32.totalorder %v1923_v5, 224 }
  0x50   : > { %v215_v14 = vrot.slane %v214_v12, 1  ;;  %v231_v31 = vrot.slane %v230_v29, 1  ;;  %s1817_s8 = sld [smem:[#allocation7 + $0x8]]  ;;  %v387_v40 = vstv %s1805_s28  ;;  %vm472_vm8 = vcmp.lt.s32.totalorder %v1847_v36, 112 }
  0x51   : > { %v222_v16 = vrot.slane %v221_v13, 1  ;;  %v238_v30 = vrot.slane %v237_v28, 1  ;;  %s1819_s12 = sld [smem:[#allocation7 + $0x9]]  ;;  %v393_v41 = vstv %s1807_s29  ;;  %vm533_vm9 = vcmp.lt.s32.totalorder %v1847_v36, 96 }
  0x52   : > { %v216_v15 = vadd.f32 %v215_v14, %v214_v12  ;;  %v1781_v33 = vmax.f32 %v230_v29, %v231_v31  ;;  %s1833_s11 = sld [smem:[#allocation7 + $0x2]]  ;;  %v399_v42 = vstv %s1809_s30  ;;  %vm594_vm11 = vcmp.lt.s32.totalorder %v1847_v36, 80 }
  0x53   : > { %v223_v18 = vadd.f32 %v222_v16, %v221_v13  ;;  %v1779_v32 = vmax.f32 %v237_v28, %v238_v30  ;;  %s1835_s0 = sld [smem:[#allocation7 + $0x3]]  ;;  %v405_v43 = vstv %s1811_s6 }
  0x54   : > { %v1757_v17 = vmul.f32 0.0625, %v216_v15  ;;  %2921 = vst [vmem:[#allocation24_spill] sm:$0xff] %v1781_v33  ;;  %s1837_s1 = sld [smem:[#allocation7 + $0x4]]  ;;  %v411_v44 = vstv %s1813_s7 }
  0x55   : > { %v1765_v19 = vmul.f32 0.0625, %v223_v18  ;;  %2920 = vst [vmem:[#allocation23_spill] sm:$0xff] %v1779_v32  ;;  %s1839_s22 = sld [smem:[#allocation7 + $0x5]]  ;;  %v314_v49 = vstv %s1815_s4 }
  0x56   : > { %304 = vrot.lane.b32.xlu1 %v1757_v17, %s1603_s24  ;;  %257 = vrot.lane.b32.xlu0 %v1757_v17, %s1604_s27  ;;  %s1841_s16 = sld [smem:[#allocation7 + $0x6]]  ;;  %v320_v50 = vstv %s1817_s8 }
  0x57   : > { %365 = vrot.lane.b32.xlu2 %v1757_v17, %s2852_s5  ;;  %s1843_s15 = sld [smem:[#allocation7 + $0x15]]  ;;  %v326_v51 = vstv %s1819_s12 }
  0x58   : > { %s1845_s19 = sld [smem:[#allocation7 + $0x16]] }
  0x59   : > { %s1849_s17 = sld [smem:[#allocation7 + $0x17]] }
  0x5a   : > { %s1851_s26 = sld [smem:[#allocation7 + $0x18]] }
  0x5b   : > { %s1853_s14 = sld [smem:[#allocation7 + $0x19]] }
  0x5c   : > { %2922 = sst [smem:[#allocation25_spill]] %s1841_s16 }
  0x5d   : > { %s1855_s25 = sld [smem:[#allocation7 + $0x1a]]  ;;  %v417_v13 = vstv %s1843_s15 }
  0x5e   : > { %306 = vrot.lane.b32.xlu1 %v1765_v19, %s1603_s24  ;;  %259 = vrot.lane.b32.xlu0 %v1765_v19, %s1604_s27  ;;  %s1860_s3 = sld [smem:[#allocation7 + $0x1b]]  ;;  %v423_v14 = vstv %s1845_s19  ;;  %v1968_v28 = vmul.f32 %v417_v13, %v1765_v19 }
  0x5f   : > { %367 = vrot.lane.b32.xlu2 %v1765_v19, %s2852_s5  ;;  %s1866_s13 = sld [smem:[#allocation7 + $0x1c]]  ;;  %v429_v15 = vstv %s1849_s17  ;;  %v1971_v29 = vmul.f32 %v423_v14, %v1765_v19 }
  0x60   : > { %s1872_s9 = sld [smem:[#allocation7 + $0x1d]]  ;;  %v435_v16 = vstv %s1851_s26  ;;  %v1974_v30 = vmul.f32 %v429_v15, %v1765_v19 }
  0x61   : > { %s1885_s21 = sld [smem:[#allocation7 + $0x1e]]  ;;  %v441_v18 = vstv %s1853_s14  ;;  %v1977_v31 = vmul.f32 %v435_v16, %v1765_v19 }
  0x62   : > { %s1891_s23 = sld [smem:[#allocation7 + $0x1f]]  ;;  %2928 = vst [vmem:[#allocation31_spill] sm:$0xff] %v1974_v30 }
  0x63   : > { %s1902_s28 = sld [smem:[#allocation7 + $0x20]]  ;;  %v447_v23 = vstv %s1855_s25  ;;  %2929 = vst [vmem:[#allocation32_spill] sm:$0xff] %v1977_v31 }
  0x64   : > { %s1908_s29 = sld [smem:[#allocation7 + $0x21]]  ;;  %v453_v24 = vstv %s1860_s3  ;;  %v1983_v35 = vmul.f32 %v447_v23, %v1765_v19 }
  0x65   : > { %s1914_s30 = sld [smem:[#allocation7 + $0x22]] }
  0x66   : > { %470 = vrot.lane.b32.xlu1 %v1765_v19, %s1606_s10  ;;  %468 = vrot.lane.b32.xlu0 %v1757_v17, %s1606_s10  ;;  %s1925_s6 = sld [smem:[#allocation7 + $0x23]]  ;;  %2931 = vst [vmem:[#allocation34_spill] sm:$0xff] %v1983_v35 }
  0x67   : > { %529 = vrot.lane.b32.xlu2 %v1757_v17, %s1607_s18  ;;  %s1935_s7 = sld [smem:[#allocation7 + $0x24]] }
  0x68   : > { %s1946_s2 = sld [smem:[#allocation7 + $0x25]] }
  0x69   : > { %s1952_s16 = sld [smem:[#allocation7 + $0x26]] }
  0x6a   : > { %s1959_s15 = sld [smem:[#allocation7 + $0x27]] }
  0x6b   : > { %s2943_s3 = sld [smem:[#allocation25_spill]] }
  0x6c   : > { %s2084_s14 = sld [smem:[#allocation7 + $0x28]] }
  0x6d   : > { %s2094_s17 = sld [smem:[#allocation7 + $0x29]] }
  0x6e   : > { %590 = vrot.lane.b32.xlu1 %v1757_v17, %s1608_s20  ;;  %531 = vrot.lane.b32.xlu0 %v1765_v19, %s1607_s18  ;;  %s2179_s19 = sld [smem:[#allocation7 + $0x2c]] }
  0x6f   : > { %592 = vrot.lane.b32.xlu2 %v1765_v19, %s1608_s20  ;;  %s2194_s25 = sld [smem:[#allocation7 + $0x2e]] }
  0x70   : > { %s2202_s26 = sld [smem:[#allocation7 + $0x2f]] }
  0x71   : > { %s2254_s4 = sld [smem:[#allocation7 + $0x36]] }
  0x72   : > { %s2261_s8 = sld [smem:[#allocation7 + $0x37]] }
  0x73   : > { %s2276_s12 = sld [smem:[#allocation7 + $0x38]] }
  0x76   : > { %643 = vrot.lane.b32.xlu1 %v1779_v32, %s1604_s27  ;;  %641 = vrot.lane.b32.xlu0 %v1781_v33, %s1604_s27  ;;  %s1823_s27 = sld [smem:[#allocation7 + $0xb]] }
  0x77   : > { %691 = vrot.lane.b32.xlu2 %v1781_v33, %s1603_s24 }
  0x7c   : > { %v338_v53 = vstv %s1823_s27  ;;  %s2287_s27 = sld [smem:[#allocation7 + $0x3a]] }
  0x7e   : > { %741 = vrot.lane.b32.xlu1 %v1781_v33, %s2852_s5  ;;  %693 = vrot.lane.b32.xlu0 %v1779_v32, %s1603_s24  ;;  %s1821_s24 = sld [smem:[#allocation7 + $0xa]] }
  0x7f   : > { %743 = vrot.lane.b32.xlu2 %v1779_v32, %s2852_s5  ;;  %s1831_s5 = sld [smem:[#allocation7 + $0x1]] }
  0x84   : > { %v332_v52 = vstv %s1821_s24  ;;  %s2279_s24 = sld [smem:[#allocation7 + $0x39]] }
  0x85   : > { %v271_v60 = vstv %s1831_s5  ;;  %s2246_s5 = sld [smem:[#allocation7 + $0x35]] }
  0x86   : > { %835 = vrot.lane.b32.xlu1 %v1779_v32, %s1606_s10  ;;  %833 = vrot.lane.b32.xlu0 %v1781_v33, %s1606_s10  ;;  %s1825_s10 = sld [smem:[#allocation7 + $0xc]] }
  0x87   : > { %883 = vrot.lane.b32.xlu2 %v1781_v33, %s1607_s18 }
  0x8c   : > { %v344_v55 = vstv %s1825_s10  ;;  %s2293_s10 = sld [smem:[#allocation7 + $0x3b]] }
  0x8e   : > { %885 = vrot.lane.b32.xlu0 %v1779_v32, %s1607_s18  ;;  %933 = vrot.lane.b32.xlu1 %v1781_v33, %s1608_s20  ;;  %s1827_s18 = sld [smem:[#allocation7 + $0xd]]  ;;  %v2942_v33 = vstv %s1833_s11 }
  0x8f   : > { %935 = vrot.lane.b32.xlu2 %v1779_v32, %s1608_s20  ;;  %s1829_s20 = sld [smem:[#allocation7]]  ;;  %v2944_v32 = vstv %s1835_s0 }
  0x90   : > { %s2169_s0 = sld [smem:[#allocation7 + $0x2a]] }
  0x91   : > { %s2214_s11 = sld [smem:[#allocation7 + $0x31]] }
  0x94   : > { %v350_v56 = vstv %s1827_s18  ;;  %s2303_s18 = sld [smem:[#allocation7 + $0x3c]] }
  0x95   : > { %v267_v59 = vstv %s1829_s20  ;;  %s2311_s20 = sld [smem:[#allocation7 + $0x3d]] }
  0xb1   : > { %v366_v34 = vpop.permute.xlu2 %365 }
  0xb9   : > { %v368_v37 = vpop.permute.xlu2 %367 }
  0xba   : > { %v371_v47 = vsel %vm369_vm1, %v368_v37, %v366_v34  ;;  %v370_v54 = vsel %vm369_vm1, %v366_v34, %v368_v37  ;;  %v1980_v34 = vmul.f32 %v441_v18, %v1765_v19  ;;  %v1986_v37 = vmul.f32 %v453_v24, %v1765_v19 }
  0xbb   : > { %v372_v58 = vmul.f32 %v1877_v46, %v371_v47  ;;  %v1916_v2 = vmul.f32 %v375_v38, %v370_v54  ;;  %v1918_v3 = vmul.f32 %v381_v39, %v370_v54  ;;  %v1920_v4 = vmul.f32 %v387_v40, %v370_v54 }
  0xbc   : > { %v1927_v6 = vmul.f32 %v393_v41, %v370_v54  ;;  %v1929_v7 = vmul.f32 %v399_v42, %v370_v54  ;;  %v1931_v8 = vmul.f32 %v405_v43, %v370_v54  ;;  %v1933_v9 = vmul.f32 %v411_v44, %v370_v54  ;;  %2930 = vst [vmem:[#allocation33_spill] sm:$0xff] %v1980_v34 }
  0xbd   : > { %v1937_v10 = vmul.f32 %v375_v38, %v372_v58  ;;  %v1939_v11 = vmul.f32 %v381_v39, %v372_v58  ;;  %v1941_v12 = vmul.f32 %v387_v40, %v372_v58  ;;  %v1954_v22 = vmul.f32 %v393_v41, %v372_v58  ;;  %2932 = vst [vmem:[#allocation35_spill] sm:$0xff] %v1986_v37 }
  0xbe   : > { %v1961_v25 = vmul.f32 %v399_v42, %v372_v58  ;;  %v1963_v26 = vmul.f32 %v405_v43, %v372_v58  ;;  %v1965_v27 = vmul.f32 %v411_v44, %v372_v58  ;;  %v1989_v38 = vsel %vm461_vm6, 1.0, %v2871_v45 }
  0xbf   : > { %2933 = vst [vmem:[#allocation36_spill] sm:$0xff] %v1989_v38  ;;  %v1999_v54 = vmul.f32 %v417_v13, %v1757_v17  ;;  %v2003_v19 = vmul.f32 %v423_v14, %v1757_v17  ;;  %v2006_v58 = vmul.f32 %v429_v15, %v1757_v17  ;;  %v2009_v41 = vmul.f32 %v435_v16, %v1757_v17 }
  0xc0   : > { %v2012_v43 = vmul.f32 %v441_v18, %v1757_v17  ;;  %v2015_v47 = vmul.f32 %v447_v23, %v1757_v17  ;;  %v2018_v13 = vmul.f32 %v453_v24, %v1757_v17  ;;  %v2023_v18 = vsel %vm522_vm7, 1.0, %v2871_v45 }
  0xc1   : > { %2934 = vst [vmem:[#allocation37_spill] sm:$0xff] %v1999_v54  ;;  %v2074_v46 = vpop.permute.xlu2 %529 }
  0xc2   : > { %2935 = vst [vmem:[#allocation38_spill] sm:$0xff] %v2003_v19 }
  0xc3   : > { %2936 = vst [vmem:[#allocation39_spill] sm:$0xff] %v2006_v58 }
  0xc4   : > { %2937 = vst [vmem:[#allocation40_spill] sm:$0xff] %v2009_v41 }
  0xc5   : > { %2938 = vst [vmem:[#allocation41_spill] sm:$0xff] %v2012_v43 }
  0xc6   : > { %2939 = vst [vmem:[#allocation42_spill] sm:$0xff] %v2015_v47 }
  0xc7   : > { %2940 = vst [vmem:[#allocation43_spill] sm:$0xff] %v2018_v13 }
  0xc8   : > { %v305_v20 = vpop.permute.xlu1 %304  ;;  %v258_v21 = vpop.permute.xlu0 %257  ;;  %2941 = vst [vmem:[#allocation44_spill] sm:$0xff] %v2023_v18 }
  0xc9   : > { %2945 = vst [vmem:[#allocation45_spill] sm:$0xff] %v2074_v46 }
  0xd0   : > { %v307_v15 = vpop.permute.xlu1 %306  ;;  %v260_v16 = vpop.permute.xlu0 %259 }
  0xd1   : > { %v309_v17 = vsel %vm308_vm4, %v305_v20, %v307_v15  ;;  %v310_v24 = vsel %vm308_vm4, %v307_v15, %v305_v20  ;;  %v262_v44 = vsel %vm261_vm5, %v258_v21, %v260_v16  ;;  %v263_v45 = vsel %vm261_vm5, %v260_v16, %v258_v21 }
  0xd2   : > { %v311_v23 = vmul.f32 %v1882_v48, %v310_v24  ;;  %v316_v40 = vmul.f32 %v314_v49, %v309_v17  ;;  %v322_v42 = vmul.f32 %v320_v50, %v309_v17  ;;  %v328_v14 = vmul.f32 %v326_v51, %v309_v17 }
  0xd3   : > { %v334_v20 = vmul.f32 %v332_v52, %v309_v17  ;;  %v340_v15 = vmul.f32 %v338_v53, %v309_v17  ;;  %v346_v39 = vmul.f32 %v344_v55, %v309_v17  ;;  %v352_v21 = vmul.f32 %v350_v56, %v309_v17 }
  0xd4   : > { %v315_v16 = vmul.f32 %v314_v49, %v311_v23  ;;  %v321_v24 = vmul.f32 %v320_v50, %v311_v23  ;;  %v327_v1 = vmul.f32 %v326_v51, %v311_v23  ;;  %v333_v0 = vmul.f32 %v332_v52, %v311_v23 }
  0xd5   : > { %v339_v63 = vmul.f32 %v338_v53, %v311_v23  ;;  %v345_v62 = vmul.f32 %v344_v55, %v311_v23  ;;  %v351_v17 = vmul.f32 %v350_v56, %v311_v23  ;;  %v264_v61 = vmul.f32 %v1900_v57, %v263_v45 }
  0xd6   : > { %v269_v49 = vmul.f32 %v267_v59, %v262_v44  ;;  %v273_v50 = vmul.f32 %v271_v60, %v262_v44  ;;  %v277_v51 = vmul.f32 %v2942_v33, %v262_v44  ;;  %v281_v52 = vmul.f32 %v2944_v32, %v262_v44 }
  0xd7   : > { %v268_v53 = vmul.f32 %v267_v59, %v264_v61  ;;  %v272_v55 = vmul.f32 %v271_v60, %v264_v61  ;;  %v2946_v48 = vmov %v2942_v33  ;;  %v2947_v23 = vmov %v2944_v32 }
  0xd8   : > { %v276_v56 = vmul.f32 %v2946_v48, %v264_v61  ;;  %v280_v45 = vmul.f32 %v2947_v23, %v264_v61  ;;  %v2948_v57 = vstv %s1837_s1  ;;  %v2950_v33 = vstv %s1839_s22  ;;  %v471_v43 = vpop.permute.xlu1 %470  ;;  %v469_v46 = vpop.permute.xlu0 %468  ;;  %s2173_s1 = sld [smem:[#allocation7 + $0x2b]] }
  0xd9   : > { %v284_v5 = vmul.f32 %v2948_v57, %v264_v61  ;;  %v2949_v18 = vmov %v2948_v57  ;;  %v288_v13 = vmul.f32 %v2950_v33, %v264_v61  ;;  %v2951_v47 = vmov %v2950_v33  ;;  %s2186_s22 = sld [smem:[#allocation7 + $0x2d]] }
  0xda   : > { %v285_v38 = vmul.f32 %v2949_v18, %v262_v44  ;;  %v289_v32 = vmul.f32 %v2951_v47, %v262_v44  ;;  %v2952_v59 = vstv %s2943_s3  ;;  %v317_v58 = vadd.f32 %v315_v16, %v268_v53  ;;  %v2966_v53 = vld [vmem:[#allocation36_spill] sm:$0xff]  ;;  %s2395_s3 = sld [smem:[#allocation7 + $0x47]] }
  0xdb   : > { %v292_v60 = vmul.f32 %v2952_v59, %v264_v61  ;;  %v2953_v41 = vmov %v2952_v59  ;;  %v318_v23 = vadd.f32 %v316_v40, %v269_v49  ;;  %v323_v19 = vadd.f32 %v321_v24, %v272_v55  ;;  %v2964_v24 = vld [vmem:[#allocation42_spill] sm:$0xff]  ;;  %v2965_v49 = vld [vmem:[#allocation43_spill] sm:$0xff] }
  0xdc   : > { %v293_v48 = vmul.f32 %v2953_v41, %v262_v44  ;;  %v324_v57 = vadd.f32 %v322_v42, %v273_v50  ;;  %v329_v54 = vadd.f32 %v327_v1, %v276_v56  ;;  %v330_v18 = vadd.f32 %v328_v14, %v277_v51 }
  0xdd   : > { %v335_v37 = vadd.f32 %v333_v0, %v280_v45  ;;  %v336_v33 = vadd.f32 %v334_v20, %v281_v52  ;;  %v341_v35 = vadd.f32 %v339_v63, %v284_v5  ;;  %v342_v47 = vadd.f32 %v340_v15, %v285_v38  ;;  %v2962_v20 = vld [vmem:[#allocation40_spill] sm:$0xff] }
  0xde   : > { %v347_v34 = vadd.f32 %v345_v62, %v288_v13  ;;  %v348_v31 = vadd.f32 %v346_v39, %v289_v32  ;;  %v353_v30 = vadd.f32 %v351_v17, %v292_v60  ;;  %v354_v61 = vadd.f32 %v352_v21, %v293_v48  ;;  %v2963_v21 = vld [vmem:[#allocation41_spill] sm:$0xff] }
  0xdf   : > { %v379_v40 = vadd.f32 %v1916_v2, %v318_v23  ;;  %v385_v41 = vadd.f32 %v1918_v3, %v324_v57  ;;  %v391_v42 = vadd.f32 %v1920_v4, %v330_v18  ;;  %v397_v1 = vadd.f32 %v1927_v6, %v336_v33 }
  0xe0   : > { %v403_v0 = vadd.f32 %v1929_v7, %v342_v47  ;;  %v409_v63 = vadd.f32 %v1931_v8, %v348_v31  ;;  %v415_v5 = vadd.f32 %v1933_v9, %v354_v61  ;;  %v378_v62 = vadd.f32 %v1937_v10, %v317_v58  ;;  %v532_v13 = vpop.permute.xlu0 %531  ;;  %v2118_v8 = vpop.permute.xlu2 %592  ;;  %v2961_v58 = vld [vmem:[#allocation39_spill] sm:$0xff]  ;;  %v2972_v47 = vld [vmem:[#allocation45_spill] sm:$0xff] }
  0xe1   : > { %v384_v38 = vadd.f32 %v1939_v11, %v323_v19  ;;  %v390_v39 = vadd.f32 %v1941_v12, %v329_v54  ;;  %v396_v2 = vadd.f32 %v1954_v22, %v335_v37  ;;  %v402_v3 = vadd.f32 %v1961_v25, %v341_v35  ;;  %v2954_v11 = vld [vmem:[#allocation31_spill] sm:$0xff]  ;;  %v2955_v12 = vld [vmem:[#allocation32_spill] sm:$0xff]  ;;  %v2956_v37 = vld [vmem:[#allocation33_spill] sm:$0xff] }
  0xe2   : > { %v408_v4 = vadd.f32 %v1963_v26, %v347_v34  ;;  %v414_v6 = vadd.f32 %v1965_v27, %v353_v30  ;;  %v569_v44 = vstv %s2084_s14  ;;  %v575_v7 = vstv %s2094_s17  ;;  %v2957_v26 = vld [vmem:[#allocation34_spill] sm:$0xff]  ;;  %v2958_v30 = vld [vmem:[#allocation35_spill] sm:$0xff]  ;;  %v2959_v35 = vld [vmem:[#allocation37_spill] sm:$0xff]  ;;  %s2407_s14 = sld [smem:[#allocation7 + $0x5d]] }
  0xe3   : > { %v421_v9 = vadd.f32 %v1968_v28, %v379_v40  ;;  %v427_v10 = vadd.f32 %v1971_v29, %v385_v41  ;;  %v433_v31 = vadd.f32 %v2954_v11, %v391_v42  ;;  %v439_v22 = vadd.f32 %v2955_v12, %v397_v1  ;;  %v2128_v28 = vpop.permute.xlu1 %590  ;;  %v2960_v29 = vld [vmem:[#allocation38_spill] sm:$0xff]  ;;  %s2421_s17 = sld [smem:[#allocation7 + $0x3f]] }
  0xe4   : > { %v445_v25 = vadd.f32 %v2956_v37, %v403_v0  ;;  %v451_v27 = vadd.f32 %v2957_v26, %v409_v63  ;;  %v457_v34 = vadd.f32 %v2958_v30, %v415_v5  ;;  %v420_v54 = vadd.f32 %v2959_v35, %v378_v62 }
  0xe5   : > { %v426_v19 = vadd.f32 %v2960_v29, %v384_v38  ;;  %v432_v14 = vadd.f32 %v2961_v58, %v390_v39  ;;  %v438_v15 = vadd.f32 %v2962_v20, %v396_v2  ;;  %v444_v16 = vadd.f32 %v2963_v21, %v402_v3  ;;  %v2982_v21 = vld [vmem:[#allocation44_spill] sm:$0xff] }
  0xe6   : > { %v450_v17 = vadd.f32 %v2964_v24, %v408_v4  ;;  %v456_v50 = vadd.f32 %v2965_v49, %v414_v6  ;;  %v473_v51 = vsel %vm472_vm8, %v469_v46, %v471_v43  ;;  %v474_v52 = vsel %vm472_vm8, %v471_v43, %v469_v46 }
  0xe7   : > { %v476_v55 = vmul.f32 %v2966_v53, %v474_v52  ;;  %v2967_v56 = vstv %s1866_s13  ;;  %v2968_v32 = vstv %s1872_s9  ;;  %v2969_v60 = vstv %s1885_s21  ;;  %s2208_s9 = sld [smem:[#allocation7 + $0x30]] }
  0xe8   : > { %v479_v45 = vmul.f32 %v2967_v56, %v473_v51  ;;  %v485_v59 = vmul.f32 %v2968_v32, %v473_v51  ;;  %v491_v48 = vmul.f32 %v2969_v60, %v473_v51  ;;  %v2970_v23 = vstv %s1891_s23  ;;  %v2175_v26 = vpop.permute.xlu0 %641  ;;  %s2237_s13 = sld [smem:[#allocation7 + $0x34]] }
  0xe9   : > { %v497_v57 = vmul.f32 %v2970_v23, %v473_v51  ;;  %v2971_v18 = vstv %s1902_s28  ;;  %v534_v61 = vsel %vm533_vm9, %v2972_v47, %v532_v13  ;;  %v535_v46 = vsel %vm533_vm9, %v532_v13, %v2972_v47  ;;  %s2318_s21 = sld [smem:[#allocation7 + $0x3e]] }
  0xea   : > { %v503_v33 = vmul.f32 %v2971_v18, %v473_v51  ;;  %v2973_v43 = vmov %v2967_v56  ;;  %v2974_v41 = vmov %v2968_v32  ;;  %v2975_v1 = vstv %s1908_s29  ;;  %s2332_s23 = sld [smem:[#allocation7 + $0x42]] }
  0xeb   : > { %v480_v40 = vmul.f32 %v2973_v43, %v476_v55  ;;  %v486_v42 = vmul.f32 %v2974_v41, %v476_v55  ;;  %v509_v0 = vmul.f32 %v2975_v1, %v473_v51  ;;  %v2976_v63 = vstv %s1914_s30  ;;  %s2341_s28 = sld [smem:[#allocation7 + $0x50]] }
  0xec   : > { %v515_v5 = vmul.f32 %v2976_v63, %v473_v51  ;;  %v481_v62 = vadd.f32 %v479_v45, %v420_v54  ;;  %v2977_v38 = vmov %v2969_v60  ;;  %v2978_v2 = vmov %v2970_v23  ;;  %s2349_s29 = sld [smem:[#allocation7 + $0x41]] }
  0xed   : > { %v492_v39 = vmul.f32 %v2977_v38, %v476_v55  ;;  %v498_v3 = vmul.f32 %v2978_v2, %v476_v55  ;;  %v499_v4 = vadd.f32 %v497_v57, %v438_v15  ;;  %v482_v6 = vadd.f32 %v480_v40, %v421_v9  ;;  %v2181_v9 = vpop.permute.xlu2 %691  ;;  %s2357_s30 = sld [smem:[#allocation7 + $0x48]] }
  0xee   : > { %v487_v13 = vadd.f32 %v485_v59, %v426_v19  ;;  %v493_v11 = vadd.f32 %v491_v48, %v432_v14  ;;  %v2979_v12 = vmov %v2971_v18  ;;  %v488_v30 = vadd.f32 %v486_v42, %v427_v10 }
  0xef   : > { %v504_v37 = vmul.f32 %v2979_v12, %v476_v55  ;;  %v500_v35 = vadd.f32 %v498_v3, %v439_v22  ;;  %v505_v54 = vadd.f32 %v503_v33, %v444_v16  ;;  %v2980_v29 = vmov %v2975_v1 }
  0xf0   : > { %v510_v58 = vmul.f32 %v2980_v29, %v476_v55  ;;  %v494_v19 = vadd.f32 %v492_v39, %v433_v31  ;;  %v511_v14 = vadd.f32 %v509_v0, %v450_v17  ;;  %v2981_v20 = vmov %v2976_v63  ;;  %v2196_v31 = vpop.permute.xlu1 %643  ;;  %v2248_v12 = vpop.permute.xlu0 %693 }
  0xf1   : > { %v516_v15 = vmul.f32 %v2981_v20, %v476_v55  ;;  %v537_v24 = vmul.f32 %v2982_v21, %v535_v46  ;;  %v506_v10 = vadd.f32 %v504_v37, %v445_v25  ;;  %v2983_v22 = vstv %s1925_s6  ;;  %s2365_s6 = sld [smem:[#allocation7 + $0x4f]] }
  0xf2   : > { %v540_v16 = vmul.f32 %v2983_v22, %v534_v61  ;;  %v2984_v49 = vstv %s1935_s7  ;;  %v2985_v52 = vstv %s1946_s2  ;;  %v512_v17 = vadd.f32 %v510_v58, %v451_v27  ;;  %s2222_s2 = sld [smem:[#allocation7 + $0x32]] }
  0xf3   : > { %v546_v51 = vmul.f32 %v2984_v49, %v534_v61  ;;  %v552_v56 = vmul.f32 %v2985_v52, %v534_v61  ;;  %v517_v55 = vadd.f32 %v515_v5, %v456_v50  ;;  %v2986_v45 = vmov %v2983_v22  ;;  %s2370_s7 = sld [smem:[#allocation7 + $0x40]] }
  0xf4   : > { %v541_v32 = vmul.f32 %v2986_v45, %v537_v24  ;;  %v2987_v59 = vmov %v2984_v49  ;;  %v518_v60 = vadd.f32 %v516_v15, %v457_v34  ;;  %v542_v48 = vadd.f32 %v540_v16, %v481_v62 }
  0xf5   : > { %v547_v25 = vmul.f32 %v2987_v59, %v537_v24  ;;  %v2988_v23 = vmov %v2985_v52  ;;  %v2989_v18 = vstv %s1952_s16  ;;  %v548_v50 = vadd.f32 %v546_v51, %v487_v13  ;;  %s2230_s16 = sld [smem:[#allocation7 + $0x33]] }
  0xf6   : > { %v553_v57 = vmul.f32 %v2988_v23, %v537_v24  ;;  %v558_v33 = vmul.f32 %v2989_v18, %v534_v61  ;;  %v2210_v27 = vadd.f32 %v541_v32, %v482_v6  ;;  %v554_v47 = vadd.f32 %v552_v56, %v493_v11 }
  0xf7   : > { %v2990_v46 = vmov %v2989_v18  ;;  %v2991_v34 = vstv %s1959_s15  ;;  %v570_v0 = vmul.f32 %v569_v44, %v534_v61  ;;  %v2224_v63 = vadd.f32 %v547_v25, %v488_v30  ;;  %s2384_s15 = sld [smem:[#allocation7 + $0x56]] }
  0xf8   : > { %v559_v43 = vmul.f32 %v2990_v46, %v537_v24  ;;  %v560_v40 = vadd.f32 %v558_v33, %v499_v4  ;;  %v564_v41 = vmul.f32 %v2991_v34, %v534_v61  ;;  %v2992_v42 = vmov %v2991_v34  ;;  %v2993_v4 = vld [vmem:[#allocation30_spill] sm:$0xff] }
  0xf9   : > { %v565_v1 = vmul.f32 %v2992_v42, %v537_v24  ;;  %v571_v62 = vmul.f32 %v569_v44, %v537_v24  ;;  %v576_v38 = vmul.f32 %v575_v7, %v534_v61  ;;  %v2232_v39 = vadd.f32 %v553_v57, %v494_v19 }
  0xfa   : > { %v561_v5 = vadd.f32 %v559_v43, %v500_v35  ;;  %v566_v2 = vadd.f32 %v564_v41, %v505_v54  ;;  %v577_v3 = vmul.f32 %v575_v7, %v537_v24  ;;  %vm583_vm10 = vcmp.lt.s32.totalorder %v2993_v4, 208  ;;  %v2256_v35 = vpop.permute.xlu2 %743 }
  0xfb   : > { %v2239_v6 = vadd.f32 %v565_v1, %v506_v10  ;;  %v572_v44 = vadd.f32 %v570_v0, %v511_v14  ;;  %v2241_v13 = vadd.f32 %v571_v62, %v512_v17  ;;  %v2994_v61 = vmov 0.0   ;;  %v2274_v10 = vpop.permute.xlu1 %741  ;;  %v2320_v1 = vpop.permute.xlu0 %833 }
  0xfc   : > { %v2244_v11 = vsel %vm583_vm10, 1.0, %v2994_v61  ;;  %v600_v7 = vstv %s2169_s0  ;;  %v606_v37 = vstv %s2173_s1  ;;  %v612_v30 = vstv %s2179_s19  ;;  %s2431_s0 = sld [smem:[#allocation7 + $0x4e]] }
  0xfd   : > { %v578_v54 = vadd.f32 %v576_v38, %v517_v55  ;;  %v618_v29 = vstv %s2186_s22  ;;  %v624_v58 = vstv %s2194_s25  ;;  %v630_v19 = vstv %s2202_s26  ;;  %s2443_s1 = sld [smem:[#allocation7 + $0x55]] }
  0xfe   : > { %v2263_v14 = vadd.f32 %v577_v3, %v518_v60  ;;  %v636_v20 = vstv %s2208_s9  ;;  %v595_v15 = vsel %vm594_vm11, %v2128_v28, %v2118_v8  ;;  %v596_v24 = vsel %vm594_vm11, %v2118_v8, %v2128_v28  ;;  %v2995_v3 = vld [vmem:[#allocation29_spill] sm:$0xff]  ;;  %s2460_s19 = sld [smem:[#allocation7 + $0x46]] }
  0xff   : > { %v598_v22 = vmul.f32 %v2244_v11, %v596_v24  ;;  %v601_v16 = vmul.f32 %v600_v7, %v595_v15  ;;  %v607_v49 = vmul.f32 %v606_v37, %v595_v15  ;;  %v613_v51 = vmul.f32 %v612_v30, %v595_v15  ;;  %s2472_s22 = sld [smem:[#allocation7 + $0x5c]] }
 0x100   : > { %v619_v52 = vmul.f32 %v618_v29, %v595_v15  ;;  %v625_v56 = vmul.f32 %v624_v58, %v595_v15  ;;  %v631_v17 = vmul.f32 %v630_v19, %v595_v15  ;;  %v650_v55 = vstv %s2214_s11  ;;  %s2482_s25 = sld [smem:[#allocation7 + $0x4d]] }
 0x101   : > { %v2282_v45 = vmul.f32 %v600_v7, %v598_v22  ;;  %v2284_v32 = vadd.f32 %v601_v16, %v542_v48  ;;  %v637_v8 = vmul.f32 %v636_v20, %v595_v15  ;;  %v656_v28 = vstv %s2222_s2  ;;  %s2493_s26 = sld [smem:[#allocation7 + $0x54]] }
 0x102   : > { %v2289_v59 = vmul.f32 %v606_v37, %v598_v22  ;;  %v2291_v25 = vadd.f32 %v607_v49, %v548_v50  ;;  %v620_v60 = vmul.f32 %v618_v29, %v598_v22  ;;  %v621_v23 = vadd.f32 %v619_v52, %v560_v40  ;;  %s2504_s9 = sld [smem:[#allocation7 + $0x5b]] }
 0x103   : > { %v2295_v57 = vmul.f32 %v612_v30, %v598_v22  ;;  %v2297_v48 = vadd.f32 %v613_v51, %v554_v47  ;;  %v2299_v18 = vmul.f32 %v624_v58, %v598_v22  ;;  %v2301_v33 = vadd.f32 %v625_v56, %v566_v2  ;;  %v2334_v2 = vpop.permute.xlu2 %883  ;;  %s2511_s11 = sld [smem:[#allocation7 + $0x43]] }
 0x104   : > { %v2305_v50 = vmul.f32 %v630_v19, %v598_v22  ;;  %v2307_v46 = vadd.f32 %v631_v17, %v572_v44  ;;  %v2309_v43 = vmul.f32 %v636_v20, %v598_v22  ;;  %v622_v40 = vadd.f32 %v620_v60, %v561_v5  ;;  %s2519_s2 = sld [smem:[#allocation7 + $0x4a]] }
 0x105   : > { %v2313_v47 = vadd.f32 %v637_v8, %v578_v54  ;;  %v662_v34 = vstv %s2230_s16  ;;  %v668_v41 = vstv %s2237_s13  ;;  %v674_v42 = vstv %s2246_s5  ;;  %s2524_s16 = sld [smem:[#allocation7 + $0x51]] }
 0x106   : > { %v680_v0 = vstv %s2254_s4  ;;  %v686_v62 = vstv %s2261_s8  ;;  %v645_v5 = vsel %vm261_vm5, %v2175_v26, %v2196_v31  ;;  %v646_v38 = vsel %vm261_vm5, %v2196_v31, %v2175_v26  ;;  %v836_v31 = vpop.permute.xlu1 %835  ;;  %s2531_s13 = sld [smem:[#allocation7 + $0x58]]  ;;  %s1610_s4 = smov 1  }
 0x107   : > { %v647_v44 = vmul.f32 %v2995_v3, %v646_v38  ;;  %v2337_v7 = vmul.f32 %v650_v55, %v645_v5  ;;  %v2887_v37 = vstv %s2276_s12  ;;  %v2888_v30 = vstv %s2279_s24  ;;  %s2536_s5 = sld [smem:[#allocation7 + $0x5f]] }
 0x108   : > { %v2343_v54 = vmul.f32 %v656_v28, %v645_v5  ;;  %v2345_v29 = vmul.f32 %v662_v34, %v645_v5  ;;  %v670_v58 = vmul.f32 %v668_v41, %v645_v5  ;;  %v2347_v26 = vmul.f32 %v674_v42, %v645_v5  ;;  %s2581_s8 = sld [smem:[#allocation7 + $0x44]] }
 0x109   : > { %v2351_v19 = vmul.f32 %v650_v55, %v647_v44  ;;  %v669_v20 = vmul.f32 %v668_v41, %v647_v44  ;;  %v2353_v15 = vmul.f32 %v680_v0, %v645_v5  ;;  %v2355_v24 = vmul.f32 %v686_v62, %v645_v5  ;;  %v2996_v41 = vld [vmem:[#allocation28_spill] sm:$0xff] }
 0x10a   : > { %v2359_v22 = vmul.f32 %v656_v28, %v647_v44  ;;  %v2361_v16 = vmul.f32 %v662_v34, %v647_v44  ;;  %v672_v49 = vadd.f32 %v670_v58, %v622_v40  ;;  %v2363_v51 = vmul.f32 %v674_v42, %v647_v44 }
 0x10b   : > { %v671_v52 = vadd.f32 %v669_v20, %v621_v23  ;;  %v2886_v56 = vstv %s2287_s27  ;;  %v718_v17 = vstv %s2293_s10  ;;  %v2885_v55 = vstv %s2303_s18  ;;  %v886_v20 = vpop.permute.xlu0 %885  ;;  %s1611_s10 = smov 2  }
 0x10c   : > { %v2372_v8 = vmul.f32 %v680_v0, %v647_v44  ;;  %v2374_v28 = vmul.f32 %v686_v62, %v647_v44  ;;  %v695_v60 = vsel %vm308_vm4, %v2181_v9, %v2248_v12  ;;  %v696_v23 = vsel %vm308_vm4, %v2248_v12, %v2181_v9 }
 0x10d   : > { %v2889_v40 = vstv %s2311_s20  ;;  %v2389_v42 = vmul.f32 %v2996_v41, %v696_v23  ;;  %v2393_v0 = vmul.f32 %v2887_v37, %v695_v60  ;;  %v2399_v62 = vmul.f32 %v2888_v30, %v695_v60  ;;  %v936_v37 = vpop.permute.xlu2 %935 }
 0x10e   : > { %v714_v5 = vmul.f32 %v2886_v56, %v695_v60  ;;  %v720_v38 = vmul.f32 %v718_v17, %v695_v60  ;;  %v2405_v9 = vmul.f32 %v2885_v55, %v695_v60  ;;  %v768_v3 = vstv %s2332_s23  ;;  %v934_v30 = vpop.permute.xlu1 %933  ;;  %s2594_s23 = sld [smem:[#allocation7 + $0x52]] }
 0x10f   : > { %v719_v12 = vmul.f32 %v718_v17, %v2389_v42  ;;  %v2415_v44 = vsel %vm369_vm1, %v2274_v10, %v2256_v35  ;;  %v746_v58 = vsel %vm369_vm1, %v2256_v35, %v2274_v10  ;;  %v2425_v41 = vmul.f32 %v2889_v40, %v695_v60  ;;  %v2998_v17 = vld [vmem:[#allocation27_spill] sm:$0xff] }
 0x110   : > { %v722_v23 = vadd.f32 %v720_v38, %v672_v49  ;;  %v2428_v55 = vmul.f32 %v2998_v17, %v746_v58  ;;  %v770_v56 = vmul.f32 %v768_v3, %v2415_v44  ;;  %v3000_v61 = vstv %s2318_s21 }
 0x111   : > { %2997 = vst [vmem:[#allocation31_spill] sm:$0xff] %v2425_v41  ;;  %v2433_v34 = vadd.f32 %v719_v12, %v671_v52  ;;  %v2437_v35 = vmul.f32 %v3000_v61, %v695_v60  ;;  %v838_v49 = vsel %vm472_vm8, %v836_v31, %v2320_v1  ;;  %v2450_v58 = vsel %vm472_vm8, %v2320_v1, %v836_v31 }
 0x112   : > { %v2445_v38 = vadd.f32 %v770_v56, %v722_v23  ;;  %v2453_v61 = vmul.f32 %v2966_v53, %v838_v49  ;;  %v2458_v52 = vsel %vm533_vm9, %v2334_v2, %v886_v20  ;;  %v2463_v56 = vmul.f32 %v768_v3, %v2428_v55 }
 0x113   : > { %2999 = vst [vmem:[#allocation32_spill] sm:$0xff] %v2433_v34  ;;  %v888_v1 = vsel %vm533_vm9, %v886_v20, %v2334_v2  ;;  %v938_v53 = vsel %vm594_vm11, %v936_v37, %v934_v30  ;;  %v616_v31 = vadd.f32 %v2295_v57, %v2232_v39  ;;  %v2894_v3 = vstv %s2349_s29 }
 0x114   : > { %3001 = vst [vmem:[#allocation33_spill] sm:$0xff] %v2445_v38  ;;  %v2475_v60 = vmul.f32 %v2982_v21, %v888_v1  ;;  %v2478_v12 = vmul.f32 %v2244_v11, %v938_v53  ;;  %v2893_v2 = vstv %s2357_s30  ;;  %v2486_v20 = vsel %vm594_vm11, %v934_v30, %v936_v37  ;;  %v3003_v11 = vld [vmem:[#allocation23_spill] sm:$0xff] }
 0x115   : > { %3002 = vst [vmem:[#allocation34_spill] sm:$0xff] %v2463_v56  ;;  %v666_v39 = vadd.f32 %v2345_v29, %v616_v31  ;;  %v764_v21 = vmul.f32 %v2894_v3, %v2415_v44  ;;  %v2891_v57 = vstv %s2365_s6  ;;  %v806_v23 = vmul.f32 %v2893_v2, %v3003_v11 }
 0x116   : > { %v856_v17 = vmul.f32 %v2891_v57, %v2453_v61  ;;  %v2890_v49 = vstv %s2384_s15  ;;  %v610_v37 = vadd.f32 %v2289_v59, %v2224_v63  ;;  %v2892_v1 = vstv %s2407_s14 }
 0x117   : > { %v716_v30 = vadd.f32 %v714_v5, %v666_v39  ;;  %v906_v29 = vmul.f32 %v2890_v49, %v2475_v60  ;;  %v756_v53 = vstv %s2370_s7  ;;  %v956_v31 = vmul.f32 %v2892_v1, %v2478_v12  ;;  %s2598_s7 = sld [smem:[#allocation7 + $0x59]] }
 0x118   : > { %v660_v10 = vadd.f32 %v2343_v54, %v610_v37  ;;  %v758_v40 = vmul.f32 %v756_v53, %v2415_v44  ;;  %v798_v63 = vstv %s2395_s3  ;;  %v848_v39 = vstv %s2431_s0  ;;  %s2611_s3 = sld [smem:[#allocation7 + $0x60]] }
 0x119   : > { %v766_v59 = vadd.f32 %v764_v21, %v716_v30  ;;  %v800_v5 = vmul.f32 %v798_v63, %v3003_v11  ;;  %v898_v49 = vstv %s2443_s1  ;;  %v850_v1 = vmul.f32 %v848_v39, %v2453_v61  ;;  %s2760_s0 = sld [smem:[#allocation2]] }
 0x11a   : > { %v710_v57 = vadd.f32 %v2399_v62, %v660_v10  ;;  %v900_v54 = vmul.f32 %v898_v49, %v2475_v60  ;;  %v604_v37 = vadd.f32 %v2282_v45, %v2210_v27  ;;  %v948_v30 = vstv %s2472_s22  ;;  %s3026_s1 = sld [smem:[#allocation16_spill]] }
 0x11b   : > { %v808_v21 = vadd.f32 %v806_v23, %v766_v59  ;;  %v750_v2 = vstv %s2421_s17  ;;  %v792_v3 = vstv %s2460_s19  ;;  %v950_v10 = vmul.f32 %v948_v30, %v2478_v12  ;;  %s1614_s17 = smov 126   ;;  %s3027_s22 = sld [smem:[#allocation21_spill]] }
 0x11c   : > { %v760_v62 = vadd.f32 %v758_v40, %v710_v57  ;;  %v654_v36 = vadd.f32 %v2337_v7, %v604_v37  ;;  %v752_v4 = vmul.f32 %v750_v2, %v2415_v44  ;;  %v794_v27 = vmul.f32 %v792_v3, %v3003_v11 }
 0x11d   : > { %v858_v38 = vadd.f32 %v856_v17, %v808_v21  ;;  %v842_v45 = vstv %s2482_s25  ;;  %v892_v23 = vstv %s2493_s26  ;;  %v942_v40 = vstv %s2504_s9  ;;  %s3028_s25 = sld [smem:[#allocation22_spill]] }
 0x11e   : > { %v802_v59 = vadd.f32 %v800_v5, %v760_v62  ;;  %v704_v41 = vadd.f32 %v2393_v0, %v654_v36  ;;  %v844_v56 = vmul.f32 %v842_v45, %v2453_v61  ;;  %v894_v7 = vmul.f32 %v892_v23, %v2475_v60 }
 0x11f   : > { %v908_v57 = vadd.f32 %v906_v29, %v858_v38  ;;  %v628_v17 = vadd.f32 %v2299_v18, %v2239_v6  ;;  %v774_v37 = vstv %s2511_s11  ;;  %v944_v5 = vmul.f32 %v942_v40, %v2478_v12  ;;  %s3029_s11 = sld [smem:[#allocation48_spill]] }
 0x120   : > { %v852_v21 = vadd.f32 %v850_v1, %v802_v59  ;;  %v754_v34 = vadd.f32 %v752_v4, %v704_v41  ;;  %v816_v36 = vstv %s2519_s2  ;;  %v776_v38 = vmul.f32 %v774_v37, %v2415_v44  ;;  %s1397_s19 = sshll.u32 %s3026_s1, 5 }
 0x121   : > { %v958_v0 = vadd.f32 %v956_v31, %v908_v57  ;;  %v678_v62 = vadd.f32 %v2347_v26, %v628_v17  ;;  %v818_v29 = vmul.f32 %v816_v36, %v3003_v11  ;;  %v2897_v1 = vstv %s2524_s16 }
 0x122   : > { %v902_v6 = vadd.f32 %v900_v54, %v852_v21  ;;  %v796_v18 = vadd.f32 %v794_v27, %v754_v34  ;;  %v916_v59 = vstv %s2531_s13  ;;  %v868_v26 = vmul.f32 %v2897_v1, %v2453_v61 }
 0x123   : > { %1040 = vrot.lane.b32.xlu2 %v958_v0, %s1610_s4  ;;  %v728_v4 = vadd.f32 %v2405_v9, %v678_v62  ;;  %v918_v41 = vmul.f32 %v916_v59, %v2475_v60  ;;  %v966_v31 = vstv %s2536_s5  ;;  %v659_v54 = vadd.f32 %v2359_v22, %v2291_v25  ;;  %v3005_v62 = vld [vmem:[#allocation24_spill] sm:$0xff] }
 0x124   : > { %v952_v57 = vadd.f32 %v950_v10, %v902_v6  ;;  %v846_v17 = vadd.f32 %v844_v56, %v796_v18  ;;  %v3004_v34 = vstv %s2279_s24  ;;  %v968_v9 = vmul.f32 %v966_v31, %v2478_v12  ;;  %s2586_s24 = sld [smem:[#allocation7 + $0x4b]] }
 0x125   : > { %v707_v27 = vmul.f32 %v3004_v34, %v2389_v42  ;;  %v778_v21 = vadd.f32 %v776_v38, %v728_v4  ;;  %v757_v0 = vmul.f32 %v756_v53, %v2428_v55  ;;  %v799_v1 = vmul.f32 %v798_v63, %v3005_v62  ;;  %s1174_s2 = scalar_lea.hbm %s3029_s11, %s1397_s19 }
 0x126   : > { %1019 = vrot.lane.b32.xlu0 %v952_v57, %s1611_s10  ;;  %v896_v56 = vadd.f32 %v894_v7, %v846_v17  ;;  %v849_v25 = vmul.f32 %v848_v39, %v2450_v58  ;;  %v899_v22 = vmul.f32 %v898_v49, %v2458_v52  ;;  %v653_v6 = vadd.f32 %v2351_v19, %v2284_v32 }
 0x127   : > { %v709_v10 = vadd.f32 %v707_v27, %v659_v54  ;;  %v820_v38 = vadd.f32 %v818_v29, %v778_v21  ;;  %v3006_v53 = vstv %s2276_s12  ;;  %v751_v18 = vmul.f32 %v750_v2, %v2428_v55  ;;  %s1612_s12 = smov 3  }
 0x128   : > { %v701_v63 = vmul.f32 %v3006_v53, %v2389_v42  ;;  %v946_v7 = vadd.f32 %v944_v5, %v896_v56  ;;  %v949_v39 = vmul.f32 %v948_v30, %v2486_v20  ;;  %v793_v49 = vmul.f32 %v792_v3, %v3005_v62 }
 0x129   : > { %v759_v4 = vadd.f32 %v757_v0, %v709_v10  ;;  %v870_v29 = vadd.f32 %v868_v26, %v820_v38  ;;  %v843_v19 = vmul.f32 %v842_v45, %v2450_v58  ;;  %v893_v2 = vmul.f32 %v892_v23, %v2458_v52 }
 0x12a   : > { %v703_v32 = vadd.f32 %v701_v63, %v653_v6  ;;  %998 = vrot.lane.b32.xlu1 %v946_v7, %s1612_s12  ;;  %v665_v30 = vadd.f32 %v2361_v16, %v2297_v48  ;;  %v3007_v3 = vstv %s2287_s27  ;;  %v3008_v26 = vstv %s2349_s29  ;;  %s2628_s27 = sld [smem:[#allocation7 + $0x45]] }
 0x12b   : > { %v801_v5 = vadd.f32 %v799_v1, %v759_v4  ;;  %v713_v57 = vmul.f32 %v3007_v3, %v2389_v42  ;;  %v763_v17 = vmul.f32 %v3008_v26, %v2428_v55  ;;  %v920_v45 = vadd.f32 %v918_v41, %v870_v29  ;;  %s2632_s29 = sld [smem:[#allocation7 + $0x4c]] }
 0x12c   : > { %v753_v23 = vadd.f32 %v751_v18, %v703_v32  ;;  %v943_v54 = vmul.f32 %v942_v40, %v2486_v20  ;;  %v3009_v1 = vstv %s2357_s30  ;;  %v3010_v16 = vstv %s2365_s6  ;;  %s2644_s30 = sld [smem:[#allocation7 + $0x5a]] }
 0x12d   : > { %v805_v34 = vmul.f32 %v3009_v1, %v3005_v62  ;;  %v851_v27 = vadd.f32 %v849_v25, %v801_v5  ;;  %v715_v48 = vadd.f32 %v713_v57, %v665_v30  ;;  %v855_v21 = vmul.f32 %v3010_v16, %v2450_v58  ;;  %s2654_s6 = sld [smem:[#allocation7 + $0x61]] }
 0x12e   : > { %v3011_v0 = vstv %s2384_s15  ;;  %v970_v10 = vadd.f32 %v968_v9, %v920_v45  ;;  %v795_v38 = vadd.f32 %v793_v49, %v753_v23  ;;  %v683_v41 = vadd.f32 %v2372_v8, %v2307_v46  ;;  %s1613_s15 = smov 127  }
 0x12f   : > { %v905_v56 = vmul.f32 %v3011_v0, %v2458_v52  ;;  %v3012_v40 = vstv %s2311_s20  ;;  %v901_v25 = vadd.f32 %v899_v22, %v851_v27  ;;  %v765_v53 = vadd.f32 %v763_v17, %v715_v48  ;;  %s2640_s20 = sld [smem:[#allocation7 + $0x53]] }
 0x130   : > { %v731_v6 = vmul.f32 %v3012_v40, %v2389_v42  ;;  %v780_v63 = vstv %s2581_s8  ;;  %v822_v18 = vstv %s2586_s24  ;;  %v845_v9 = vadd.f32 %v843_v19, %v795_v38 }
 0x131   : > { %v781_v4 = vmul.f32 %v780_v63, %v2428_v55  ;;  %v823_v46 = vmul.f32 %v822_v18, %v3005_v62  ;;  %v951_v8 = vadd.f32 %v949_v39, %v901_v25  ;;  %v807_v22 = vadd.f32 %v805_v34, %v765_v53 }
 0x132   : > { %v733_v7 = vadd.f32 %v731_v6, %v683_v41  ;;  %v872_v49 = vstv %s2594_s23  ;;  %v922_v29 = vstv %s2598_s7  ;;  %v3013_v32 = vstv %s2341_s28  ;;  %1063 = vrot.lane.b32.xlu1 %v970_v10, %s1613_s15 }
 0x133   : > { %v2649_v19 = vmul.f32 %v3013_v32, %v2450_v58  ;;  %v895_v5 = vadd.f32 %v893_v2, %v845_v9  ;;  %v873_v3 = vmul.f32 %v872_v49, %v2450_v58  ;;  %1017 = vrot.lane.b32.xlu2 %v951_v8, %s1611_s10  ;;  %v857_v39 = vadd.f32 %v855_v21, %v807_v22  ;;  %s1163_s10 = scalar_lea.sflag [#allocation5], %s3027_s22 }
 0x134   : > { %v783_v30 = vadd.f32 %v781_v4, %v733_v7  ;;  %v972_v57 = vstv %s2611_s3  ;;  %v677_v2 = vadd.f32 %v2363_v51, %v2301_v33  ;;  %v3014_v26 = vstv %s2303_s18  ;;  %s2695_s18 = sld [smem:[#allocation7 + $0x49]]  ;;  %s1548_s3 = scalar_lea.hbm %s3029_s11, 64 }
 0x135   : > { %v725_v17 = vmul.f32 %v3014_v26, %v2389_v42  ;;  %v945_v45 = vadd.f32 %v943_v54, %v895_v5  ;;  %v923_v1 = vmul.f32 %v922_v29, %v2458_v52  ;;  %v775_v34 = vmul.f32 %v774_v37, %v2428_v55 }
 0x136   : > { %v825_v23 = vadd.f32 %v823_v46, %v783_v30  ;;  %v907_v27 = vadd.f32 %v905_v56, %v857_v39  ;;  %v3015_v48 = vstv %s2407_s14  ;;  %v817_v51 = vmul.f32 %v816_v36, %v3005_v62  ;;  %s2698_s14 = sld [smem:[#allocation7 + $0x57]] }
 0x137   : > { %v955_v16 = vmul.f32 %v3015_v48, %v2486_v20  ;;  %v727_v33 = vadd.f32 %v725_v17, %v677_v2  ;;  %996 = vrot.lane.b32.xlu0 %v945_v45, %s1612_s12  ;;  %v973_v21 = vmul.f32 %v972_v57, %v2486_v20  ;;  %v3016_v0 = vstv %s2524_s16  ;;  %s3030_s16 = sshll.u32 %s3027_s22, 5 }
 0x138   : > { %v875_v54 = vadd.f32 %v873_v3, %v825_v23  ;;  %v867_v10 = vmul.f32 %v3016_v0, %v2450_v58  ;;  %v917_v37 = vmul.f32 %v916_v59, %v2458_v52  ;;  %v689_v38 = vadd.f32 %v2374_v28, %v2313_v47  ;;  %v3021_v0 = vld [vmem:[#allocation31_spill] sm:$0xff]  ;;  %s205_s13 = scalar_lea.vmem [#allocation8], %s3030_s16 }
 0x139   : > { %v777_v56 = vadd.f32 %v775_v34, %v727_v33  ;;  %v3017_v36 = vstv %s2318_s21  ;;  %v786_v40 = vstv %s2628_s27  ;;  %v828_v53 = vstv %s2632_s29  ;;  %s2709_s21 = sld [smem:[#allocation7 + $0x5e]]  ;;  %v3018_v33 = vld [vmem:[#allocation32_spill] sm:$0xff]  ;;  %s1175_s5 = sshll.u32 %s205_s13, 4  ;;  %s1176_s5 = int_to_ptr.vmem [resolvable:$true] %s1175_s5 }
 0x13a   : > { %v737_v41 = vmul.f32 %v3017_v36, %v2389_v42  ;;  %v925_v6 = vadd.f32 %v923_v1, %v875_v54  ;;  %v787_v25 = vmul.f32 %v786_v40, %v2428_v55  ;;  %v878_v9 = vstv %s2640_s20 }
 0x13b   : > { %v957_v7 = vadd.f32 %v955_v16, %v907_v27  ;;  %v819_v59 = vadd.f32 %v817_v51, %v777_v56  ;;  %v829_v46 = vmul.f32 %v828_v53, %v3005_v62  ;;  %v928_v28 = vstv %s2644_s30  ;;  %v3019_v51 = vld [vmem:[#allocation34_spill] sm:$0xff] }
 0x13c   : > { %v739_v4 = vadd.f32 %v737_v41, %v689_v38  ;;  %v975_v47 = vadd.f32 %v973_v21, %v925_v6  ;;  %v978_v8 = vstv %s2654_s6  ;;  %v640_v42 = vadd.f32 %v2309_v43, %v2263_v14 }
 0x13d   : > { %1038 = vrot.lane.b32.xlu1 %v957_v7, %s1610_s4  ;;  %v869_v55 = vadd.f32 %v867_v10, %v819_v59  ;;  %v967_v22 = vmul.f32 %v966_v31, %v2486_v20  ;;  %v879_v5 = vmul.f32 %v878_v9, %v2450_v58  ;;  %v929_v30 = vmul.f32 %v928_v28, %v2458_v52  ;;  %s1177_s4 = sshll.u32 %s1174_s2, 4  ;;  %s1178_s4 = int_to_ptr.hbm [resolvable:$true] %s1177_s4 }
 0x13e   : > { %v789_v32 = vadd.f32 %v787_v25, %v739_v4  ;;  %1082 = vrot.lane.b32.xlu2 %v975_v47, %s1614_s17  ;;  %v979_v14 = vmul.f32 %v978_v8, %v2486_v20  ;;  %v690_v43 = vadd.f32 %v2355_v24, %v640_v42  ;;  %v788_v3 = vmul.f32 %v786_v40, %v2415_v44  ;;  %s1542_s24 = sshra.s32 %s1178_s4, 4  ;;  %s1543_s24 = int_to_ptr.hbm [resolvable:$true] %s1542_s24 }
 0x13f   : > { %v919_v31 = vadd.f32 %v917_v37, %v869_v55  ;;  %v830_v58 = vmul.f32 %v828_v53, %v3003_v11  ;;  %v880_v2 = vmul.f32 %v878_v9, %v2453_v61  ;;  %v930_v17 = vmul.f32 %v928_v28, %v2475_v60  ;;  %s1544_s23 = scalar_lea.hbm %s1543_s24, 32  ;;  %p1549_p0 = scmp.lt.s32.totalorder %s1543_s24, %s3029_s11 }
 0x140   : > { %v831_v39 = vadd.f32 %v829_v46, %v789_v32  ;;  %v740_v26 = vadd.f32 %v2437_v35, %v690_v43  ;;  %v980_v45 = vmul.f32 %v978_v8, %v2478_v12  ;;  %v634_v24 = vadd.f32 %v2305_v50, %v2241_v13  ;;  %p1545_p4 = scmp.ne.s32.totalorder %s1543_s24, %s1544_s23  ;;  %p1550_p3 = scmp.lt.s32.totalorder %s1548_s3, %s1544_s23 }
 0x141   : > { %v969_v23 = vadd.f32 %v967_v22, %v919_v31  ;;  %v782_v34 = vmul.f32 %v780_v63, %v2415_v44  ;;  %v824_v27 = vmul.f32 %v822_v18, %v3003_v11  ;;  %v874_v16 = vmul.f32 %v872_v49, %v2453_v61 }
 0x142   : > { %v881_v1 = vadd.f32 %v879_v5, %v831_v39  ;;  %v790_v48 = vadd.f32 %v788_v3, %v740_v26  ;;  %v684_v35 = vadd.f32 %v2353_v15, %v634_v24  ;;  %v771_v54 = vadd.f32 %v3019_v51, %v3018_v33  ;;  %v3024_v5 = vld [vmem:[#allocation26_spill] sm:$0xff]  ;;  %p1546_p6 = pnand %p1545_p4, %p1692_p11  ;;  %p1551_p5 = por %p1550_p3, %p1549_p0 }
 0x143   : > { %1061 = vrot.lane.b32.xlu0 %v969_v23, %s1613_s15  ;;  %v810_v50 = vstv %s2695_s18  ;;  %v3020_v21 = vstv %s2341_s28  ;;  %v910_v63 = vstv %s2698_s14  ;;  %s1615_s28 = smov 125   ;;  %v924_v53 = vmul.f32 %v922_v29, %v2475_v60 }
 0x144   : > { %v931_v13 = vadd.f32 %v929_v30, %v881_v1  ;;  %v862_v44 = vmul.f32 %v3020_v21, %v2453_v61  ;;  %v832_v18 = vadd.f32 %v830_v58, %v790_v48  ;;  %v734_v10 = vadd.f32 %v3021_v0, %v684_v35  ;;  %v3022_v61 = vld [vmem:[#allocation33_spill] sm:$0xff]  ;;  %p1547_p13 = pneg %p1546_p6 }
 0x145   : > { %v811_v15 = vmul.f32 %v810_v50, %v3005_v62  ;;  %v812_v37 = vmul.f32 %v810_v50, %v3003_v11  ;;  %v911_v56 = vmul.f32 %v910_v63, %v2458_v52  ;;  %v912_v38 = vmul.f32 %v910_v63, %v2475_v60 }
 0x146   : > { %v981_v49 = vadd.f32 %v979_v14, %v931_v13  ;;  %v960_v36 = vstv %s2709_s21  ;;  %v882_v41 = vadd.f32 %v880_v2, %v832_v18  ;;  %v784_v40 = vadd.f32 %v782_v34, %v734_v10  ;;  %p1552_p8 = pnand %p1551_p5, %p1547_p13 }
 0x147   : > { %v813_v6 = vadd.f32 %v811_v15, %v771_v54  ;;  %v814_v25 = vadd.f32 %v812_v37, %v3022_v61  ;;  %v961_v62 = vmul.f32 %v960_v36, %v2486_v20  ;;  %v962_v11 = vmul.f32 %v960_v36, %v2478_v12 }
 0x148   : > { %1103 = vrot.lane.b32.xlu1 %v981_v49, %s1615_s28  ;;  %v932_v9 = vadd.f32 %v930_v17, %v882_v41  ;;  %v826_v52 = vadd.f32 %v824_v27, %v784_v40  ;;  %v974_v4 = vmul.f32 %v972_v57, %v2478_v12  ;;  %vm1000_vm13 = vcmp.lt.s32.totalorder %v3024_v5, 3 }
 0x149   : > { %v863_v7 = vadd.f32 %v2649_v19, %v813_v6  ;;  %v864_v59 = vadd.f32 %v862_v44, %v814_v25  ;;  %v3023_v19 = vld [vmem:[#allocation30_spill] sm:$0xff]  ;;  %vm1021_vm15 = vcmp.lt.s32.totalorder %v3024_v5, 2  ;;  %v3025_v30 = vmov 0.0  }
 0x14a   : > { %v982_v46 = vadd.f32 %v980_v45, %v932_v9  ;;  %v876_v47 = vadd.f32 %v874_v16, %v826_v52  ;;  %v2763_v12 = vand.u32 15, %v3023_v19  ;;  %v245_v43 = vand.u32 15, %v3024_v5 }
 0x14b   : > { %v913_v28 = vadd.f32 %v911_v56, %v863_v7  ;;  %v914_v8 = vadd.f32 %v912_v38, %v864_v59  ;;  %v984_v39 = vstv %s2760_s0  ;;  %vm1042_vm2 = vcmp.lt.s32.totalorder %v3024_v5, 1 }
 0x14c   : > { %1105 = vrot.lane.b32.xlu2 %v982_v46, %s1615_s28  ;;  %v926_v42 = vadd.f32 %v924_v53, %v876_v47  ;;  %vm987_vm12 = vcmp.ge.s32.totalorder %v2763_v12, 3  ;;  %vm1008_vm14 = vcmp.ge.s32.totalorder %v2763_v12, 2  ;;  %vm1029_vm0 = vcmp.ge.s32.totalorder %v2763_v12, 1 }
 0x14d   : > { %v2757_v55 = vadd.f32 %v961_v62, %v913_v28  ;;  %v964_v60 = vadd.f32 %v962_v11, %v914_v8  ;;  %v1378_v14 = vsel %vm987_vm12, 1.0, %v3025_v30  ;;  %v1380_v2 = vsel %vm1008_vm14, 1.0, %v3025_v30 }
 0x14e   : > { %v976_v20 = vadd.f32 %v974_v4, %v926_v42  ;;  %vm986_vm1 = vcmp.ge.s32.totalorder %v245_v43, 3  ;;  %v1382_v24 = vsel %vm1029_vm0, 1.0, %v3025_v30  ;;  %vm1007_vm3 = vcmp.ge.s32.totalorder %v245_v43, 2 }
 0x14f   : > { %v1377_v1 = vsel %vm986_vm1, 1.0, %v3025_v30  ;;  %vm1054_vm4 = vcmp.lt.s32.totalorder %v2763_v12, 15  ;;  %vm1028_vm5 = vcmp.ge.s32.totalorder %v245_v43, 1  ;;  %vm1065_vm6 = vcmp.lt.s32.totalorder %v3024_v5, 127 }
 0x150   : > { %1084 = vrot.lane.b32.xlu0 %v976_v20, %s1614_s17  ;;  %v1379_v54 = vsel %vm1007_vm3, 1.0, %v3025_v30  ;;  %v1384_v13 = vsel %vm1054_vm4, 1.0, %v3025_v30  ;;  %v1381_v21 = vsel %vm1028_vm5, 1.0, %v3025_v30  ;;  %vm1053_vm7 = vcmp.lt.s32.totalorder %v245_v43, 15 }
 0x151   : > { %vm1074_vm8 = vcmp.lt.s32.totalorder %v245_v43, 14  ;;  %vm1075_vm9 = vcmp.lt.s32.totalorder %v2763_v12, 14  ;;  %v1383_v40 = vsel %vm1053_vm7, 1.0, %v3025_v30  ;;  %vm1095_vm10 = vcmp.lt.s32.totalorder %v245_v43, 13 }
 0x152   : > { %vm1096_vm11 = vcmp.lt.s32.totalorder %v2763_v12, 13  ;;  %vm1107_vm12 = vcmp.lt.s32.totalorder %v3024_v5, 125  ;;  %v1385_v53 = vsel %vm1074_vm8, 1.0, %v3025_v30  ;;  %v1386_v62 = vsel %vm1075_vm9, 1.0, %v3025_v30 }
 0x153   : > { %v1387_v52 = vsel %vm1095_vm10, 1.0, %v3025_v30  ;;  %v1388_v7 = vsel %vm1096_vm11, 1.0, %v3025_v30 }
 0x17d   : > { %v1041_v32 = vpop.permute.xlu2 %1040 }
 0x18d   : > { %v1018_v31 = vpop.permute.xlu2 %1017 }
 0x198   : > { %v1020_v22 = vpop.permute.xlu0 %1019  ;;  %v1083_v37 = vpop.permute.xlu2 %1082 }
 0x199   : > { %v1022_v26 = vsel %vm1021_vm15, %v1018_v31, %v1020_v22  ;;  %v1023_v50 = vsel %vm1021_vm15, %v1020_v22, %v1018_v31 }
 0x19a   : > { %v1025_v23 = vmul.f32 %v1380_v2, %v1022_v26  ;;  %v1024_v49 = vmul.f32 %v1379_v54, %v1023_v50 }
 0x19c   : > { %v999_v29 = vpop.permute.xlu1 %998 }
 0x1a4   : > { %v1064_v57 = vpop.permute.xlu1 %1063 }
 0x1a6   : > { %v1106_v11 = vpop.permute.xlu2 %1105 }
 0x1a9   : > { %v997_v3 = vpop.permute.xlu0 %996 }
 0x1aa   : > { %v1001_v58 = vsel %vm1000_vm13, %v997_v3, %v999_v29  ;;  %v1002_v34 = vsel %vm1000_vm13, %v999_v29, %v997_v3  ;;  %vm1086_vm13 = vcmp.lt.s32.totalorder %v3024_v5, 126 }
 0x1ab   : > { %v1004_v17 = vmul.f32 %v1378_v14, %v1001_v58  ;;  %v1003_v33 = vmul.f32 %v1377_v1, %v1002_v34 }
 0x1ad   : > { %v1006_v45 = vadd.f32 %v1004_v17, %v984_v39  ;;  %v1005_v0 = vadd.f32 %v1003_v33, %v984_v39 }
 0x1af   : > { %v1039_v27 = vpop.permute.xlu1 %1038  ;;  %v1027_v35 = vadd.f32 %v1025_v23, %v1006_v45  ;;  %v1026_v36 = vadd.f32 %v1024_v49, %v1005_v0 }
 0x1b0   : > { %v1043_v48 = vsel %vm1042_vm2, %v1039_v27, %v1041_v32  ;;  %v1044_v44 = vsel %vm1042_vm2, %v1041_v32, %v1039_v27 }
 0x1b1   : > { %v1046_v16 = vmul.f32 %v1382_v24, %v1043_v48  ;;  %v1045_v56 = vmul.f32 %v1381_v21, %v1044_v44  ;;  %v1479_v44 = vld [vmem:[%s3028_s25] sm:$0xff] }
 0x1b3   : > { %v1048_v51 = vadd.f32 %v1046_v16, %v1027_v35  ;;  %v1047_v41 = vadd.f32 %v1045_v56, %v1026_v36 }
 0x1b5   : > { %v1050_v63 = vadd.f32 %v1048_v51, %v964_v60  ;;  %v1062_v18 = vpop.permute.xlu0 %1061  ;;  %v1049_v61 = vadd.f32 %v1047_v41, %v2757_v55 }
 0x1b6   : > { %v1067_v10 = vsel %vm1065_vm6, %v1064_v57, %v1062_v18  ;;  %v1066_v6 = vsel %vm1065_vm6, %v1062_v18, %v1064_v57  ;;  %v1480_v18 = vld [vmem:[%s3028_s25 + $0x10] sm:$0xff] }
 0x1b7   : > { %v1069_v15 = vmul.f32 %v1384_v13, %v1067_v10  ;;  %v1068_v9 = vmul.f32 %v1383_v40, %v1066_v6  ;;  %v1481_v10 = vld [vmem:[%s3028_s25 + $0x8] sm:$0xff] }
 0x1b9   : > { %v1071_v38 = vadd.f32 %v1069_v15, %v1050_v63  ;;  %v1070_v8 = vadd.f32 %v1068_v9, %v1049_v61 }
 0x1ba   : > { %v1104_v25 = vpop.permute.xlu1 %1103 }
 0x1bb   : > { %v1108_v4 = vsel %vm1107_vm12, %v1104_v25, %v1106_v11  ;;  %v1109_v46 = vsel %vm1107_vm12, %v1106_v11, %v1104_v25 }
 0x1bc   : > { %v1110_v60 = vmul.f32 %v1387_v52, %v1108_v4  ;;  %v1111_v20 = vmul.f32 %v1388_v7, %v1109_v46 }
 0x1c2   : > { %v1085_v59 = vpop.permute.xlu0 %1084 }
 0x1c3   : > { %v1087_v47 = vsel %vm1086_vm13, %v1083_v37, %v1085_v59  ;;  %v1088_v28 = vsel %vm1086_vm13, %v1085_v59, %v1083_v37  ;;  %v1482_v37 = vld [vmem:[%s3028_s25 + $0x18] sm:$0xff] }
 0x1c4   : > { %v1089_v42 = vmul.f32 %v1385_v53, %v1087_v47  ;;  %v1090_v55 = vmul.f32 %v1386_v62, %v1088_v28 }
 0x1c6   : > { %v1091_v29 = vadd.f32 %v1089_v42, %v1070_v8  ;;  %v1092_v22 = vadd.f32 %v1090_v55, %v1071_v38 }
 0x1c8   : > { %v1112_v32 = vadd.f32 %v1110_v60, %v1091_v29  ;;  %v1113_v19 = vadd.f32 %v1111_v20, %v1092_v22 }
 0x1ca   : > { %v1389_v12 = vmul.f32 -1.442695, %v1112_v32  ;;  %v1390_v57 = vmul.f32 -1.442695, %v1113_v19 }
 0x1cc   : > { %1471 = vpow2.f32 %v1389_v12 }
 0x1cd   : > { %1473 = vpow2.f32 %v1390_v57 }
 0x1d2   : > { %v1472_v5 = vpop.eup %1471 }
 0x1d3   : > { %v1474_v30 = vpop.eup %1473  ;;  %v1120_v14 = vadd.f32 1.0, %v1472_v5 }
 0x1d4   : > { %v1121_v43 = vadd.f32 1.0, %v1474_v30 }
 0x1d5   : > { %1475 = vrcp.f32 %v1120_v14  ;;  %v1133_v26 = vand.u32 2147483648, %v1120_v14  ;;  %v1131_v24 = vand.u32 2147483647, %v1120_v14  ;;  %vm1127_vm0 = vweird.f32 %v1120_v14 }
 0x1d6   : > { %1477 = vrcp.f32 %v1121_v43  ;;  %v1148_v23 = vand.u32 2147483648, %v1121_v43  ;;  %v1146_v34 = vand.u32 2147483647, %v1121_v43  ;;  %vm1142_vm2 = vweird.f32 %v1121_v43 }
 0x1d7   : > { %v1134_v48 = vor.u32 1.1754944e-38, %v1133_v26  ;;  %vm1132_vm3 = vcmp.eq.f32.partialorder %v1131_v24, 8.507059e+37 }
 0x1d8   : > { %v1149_v33 = vor.u32 1.1754944e-38, %v1148_v23  ;;  %vm1147_vm5 = vcmp.eq.f32.partialorder %v1146_v34, 8.507059e+37 }
 0x1db   : > { %v1476_v3 = vpop.eup %1475 }
 0x1dc   : > { %v1478_v31 = vpop.eup %1477  ;;  %v1123_v39 = vmul.f32 %v1476_v3, %v1120_v14  ;;  %vm1128_vm14 = vweird.f32 %v1476_v3 }
 0x1dd   : > { %v1138_v58 = vmul.f32 %v1478_v31, %v1121_v43  ;;  %vm1143_vm15 = vweird.f32 %v1478_v31  ;;  %vm1129_vm1 = vmor %vm1127_vm0, %vm1128_vm14 }
 0x1de   : > { %v1124_v2 = vsub.f32 1.0, %v1123_v39  ;;  %vm1144_vm4 = vmor %vm1142_vm2, %vm1143_vm15 }
 0x1df   : > { %v1139_v17 = vsub.f32 1.0, %v1138_v58 }
 0x1e0   : > { %v1125_v45 = vmul.f32 %v1476_v3, %v1124_v2 }
 0x1e1   : > { %v1140_v1 = vmul.f32 %v1478_v31, %v1139_v17 }
 0x1e2   : > { %v1126_v27 = vadd.f32 %v1476_v3, %v1125_v45 }
 0x1e3   : > { %v1141_v35 = vadd.f32 %v1478_v31, %v1140_v1 }
 0x1e4   : > { %v1130_v16 = vsel %vm1129_vm1, %v1476_v3, %v1126_v27 }
 0x1e5   : > { %v1145_v51 = vsel %vm1144_vm4, %v1478_v31, %v1141_v35  ;;  %v1135_v54 = vsel %vm1132_vm3, %v1134_v48, %v1130_v16 }
 0x1e6   : > { %v1150_v13 = vsel %vm1147_vm5, %v1149_v33, %v1145_v51  ;;  %v1152_v50 = vperm.slane %v1135_v54, 0 }
 0x1e7   : > { %v1153_v21 = vperm.slane %v1150_v13, 0 }
 0x1e8   : > { %v1154_v63 = vmul.f32 %v1479_v44, %v1152_v50  ;;  %v1156_v0 = vmul.f32 %v1480_v18, %v1152_v50 }
 0x1e9   : > { %v1155_v15 = vmul.f32 %v1481_v10, %v1153_v21  ;;  %v1157_v49 = vmul.f32 %v1482_v37, %v1153_v21 }
 0x1ea   : > { %1158 = vst [vmem:[%s205_s13] sm:$0xff] %v1154_v63 }
 0x1eb   : > { %1159 = vst [vmem:[%s205_s13 + $0x8] sm:$0xff] %v1155_v15 }
 0x1ec   : > { %1160 = vst [vmem:[%s205_s13 + $0x10] sm:$0xff] %v1156_v0 }
 0x1ed   : > { %1161 = vst [vmem:[%s205_s13 + $0x18] sm:$0xff] %v1157_v49 }
 0x1ee   : > { %1555 = shalt.err (!%p1552_p8)
}
 0x1ef   : > { %s1616_s20 = smov 256   ;;  %s3032_s30 = smov 16  }
 0x1f0   : > { %1404 = dma.vmem_to_hbm [thread:$0]  (%p1692_p11), %s1176_s5, 512, %s1178_s4, %s1163_s10, %s1616_s20, %s1616_s20, %s3032_s30  }
 0x1f1 PF: > { %s3033_s6 = sld [smem:[#allocation12_spill]] }
 0x1f2   : > { %s3035_s18 = sld [smem:[#allocation15_spill]] }
 0x1f7   : > { %s1192_s14 = sand.u32 1, %s3033_s6  }
 0x1f8   : > { %p3036_p9 = scmp.ge.s32.totalorder %s3035_s18, 2  ;;  %s1193_s21 = scalar_lea.sflag [#allocation5], %s1192_s14 }
 0x1fa   : > { %p1415_p10 = pnand %p3036_p9, %p1696_p12 }
 0x1fc   : > { %p1416_p1 = pneg %p1415_p10 }
 0x1fe   : > { %1581 = dma.done.wait (%p1416_p1), %s1193_s21, 512  }
 0x1ff   : > { %1583 = vsyncadd (%p1416_p1), %s1193_s21, 4294966784  ;;  %s3037_s17 = sld [smem:[#allocation17_spill]] }
 0x200   : > { %s3038_s14 = sld [smem:[#allocation13_spill]] }
 0x201   : > { %s3039_s15 = sld [smem:[#allocation14_spill]] }
 0x202   : > { %s3040_s16 = sld [smem:[#allocation18_spill]] }
 0x205   : > { %p18_p2 = scmp.ge.s32.totalorder %s3037_s17, 4  }
 0x207   :  { %20 = sbr.rel (!%p18_p2) target bundleno = 11 (0xb), region = 82 }
 0x20c   :  { %1199 = vsyncpa [#allocation4], 1 }
 0x20d   :  { %1201 = vsyncpa [#allocation4 + $0x1], 1 }
 0x20e   :  { %1202 = vsyncpa [#allocation5], 1 }
 0x20f   :  { %1204 = vsyncpa [#allocation5 + $0x1], 1 }
 0x210   :  { %1205 = vsyncpa [#allocation6], 1 }
 0x211   :  { %1207 = vsyncpa [#allocation6 + $0x1], 1 }

</bundles_post_ra>
